<compile_context>
chip_gen: v7x
topology: tpu7x:2x2x1
jax: 0.10.0
libtpu: 0.0.40
codegen_flags: <defaults>
</compile_context>

<pallas_src>
import jax
import jax.numpy as jnp
from jax import lax
from jax.experimental import pallas as pl
from jax.experimental.pallas import tpu as pltpu


C_IN = 6
C_OUT = 6
C_PAD = 8                    # pad output channels to a full sublane for the matmul
KH = KW = 4
STRIDE = 2
PAD = 1
K = KH * KW * C_IN           # 96 im2col rows, ordered (kh, kw, c_in)


def _conv_leaky_kernel(xs_ref, w_ref, b_ref, o_ref, p_ref):
    """One grid step == one image.

    xs_ref: (1, 2*Hp, C_IN, Wo+1) f32   W-phase-split, zero-padded input:
                                        xs[0, r*Hp + h, c, j] == x_pad[c, h, 2*j + r]
    w_ref : (C_PAD, K)  f32             weight matrix, K ordered (kh, kw, c_in)
    b_ref : (C_PAD, 1)  f32
    o_ref : (1, C_OUT, Ho*Wo) f32       NCHW-compatible (row-major (ho, wo) on lanes)
    p_ref : (K, Ho*Wo)  f32             VMEM scratch — im2col patches built in-kernel
    """
    hp = xs_ref.shape[1] // 2
    wo = xs_ref.shape[3] - 1
    m_img = o_ref.shape[2]
    ho = m_img // wo

    # ---- fused im2col: gather the 16 kernel taps for one output row at a time.
    # Only plain offset slices: leading-dim scalar index + lane offset in {0,1}
    # on the read side, sublane/lane offset slices on the scratch store side.
    def fill_row(r_ho, carry=0):
        col = r_ho * wo                        # lane offset of this output row
        for kh in range(KH):                   # static
            for kw in range(KW):               # static
                r, q = kw % 2, kw // 2         # W phase / offset within the phase
                row = r * hp + STRIDE * r_ho + kh
                tap = xs_ref[0, row, :, pl.ds(q, wo)]               # (C_IN, wo)
                k = kh * KW + kw
                p_ref[pl.ds(k * C_IN, C_IN), pl.ds(col, wo)] = tap
        return carry

    if ho <= 32:                               # static unroll for small images
        for r_ho in range(ho):
            fill_row(r_ho)
    else:                                      # runtime loop for big images
        lax.fori_loop(0, ho, fill_row, 0)

    # ---- conv == one (C_PAD, K) @ (K, Ho*Wo) matmul, f32 accumulate on MXU.
    acc = jnp.dot(w_ref[...], p_ref[...], preferred_element_type=jnp.float32)
    acc = acc + b_ref[...]                     # bias broadcast along lanes
    # where(v > 0, v, v * 0.1); the module's `negative_slope = 100` is dead code.
    acc = jnp.where(acc > 0.0, acc, acc * 0.1)
    o_ref[0, :, :] = acc[:C_OUT, :]


def conv2d_leaky(x, weight, bias):
    """x: (N, 6, H, W) f32.  weight: (6, 6, 4, 4).  bias: (6,).  Returns NCHW f32."""
    n, c, h, w = x.shape
    assert c == C_IN
    ho = (h + 2 * PAD - KH) // STRIDE + 1
    wo = (w + 2 * PAD - KW) // STRIDE + 1
    hp = STRIDE * ho + 2          # padded rows actually touched by the conv
    wp = STRIDE * (wo + 1)        # padded cols actually touched (always even)
    m_img = ho * wo

    # Zero-pad (top/left = PAD, bottom/right up to hp/wp) and de-interleave W
    # into even/odd phases so the kernel never needs lane-strided reads:
    #   xs[n, r, h, c, j] = x_pad[n, c, h, 2*j + r]
    xp = jnp.pad(x.astype(jnp.float32),
                 ((0, 0), (0, 0), (PAD, hp - h - PAD), (PAD, wp - w - PAD)))
    xs = xp.reshape(n, C_IN, hp, wo + 1, 2).transpose(0, 4, 2, 1, 3)
    xs = xs.reshape(n, 2 * hp, C_IN, wo + 1)

    # Weight as a (C_PAD, K) matrix with K ordered (kh, kw, c_in); bias as (C_PAD, 1).
    w_mat = jnp.transpose(weight.astype(jnp.float32), (0, 2, 3, 1)).reshape(C_OUT, K)
    w_mat = jnp.pad(w_mat, ((0, C_PAD - C_OUT), (0, 0)))
    b_mat = jnp.pad(bias.astype(jnp.float32).reshape(C_OUT, 1),
                    ((0, C_PAD - C_OUT), (0, 0)))

    out = pl.pallas_call(
        _conv_leaky_kernel,
        out_shape=jax.ShapeDtypeStruct((n, C_OUT, m_img), jnp.float32),
        grid_spec=pltpu.PrefetchScalarGridSpec(
            num_scalar_prefetch=0,
            grid=(n,),
            in_specs=[
                pl.BlockSpec((1, 2 * hp, C_IN, wo + 1), lambda i: (i, 0, 0, 0)),
                pl.BlockSpec((C_PAD, K), lambda i: (0, 0)),      # weight (resident)
                pl.BlockSpec((C_PAD, 1), lambda i: (0, 0)),      # bias (resident)
            ],
            out_specs=pl.BlockSpec((1, C_OUT, m_img), lambda i: (i, 0, 0)),
            scratch_shapes=[pltpu.VMEM((K, m_img), jnp.float32)],
        ),
        compiler_params=pltpu.CompilerParams(
            dimension_semantics=("parallel",),
            vmem_limit_bytes=32 * 1024 * 1024,
        ),
        cost_estimate=pl.CostEstimate(
            flops=2 * C_OUT * K * n * m_img,
            transcendentals=0,
            bytes_accessed=(x.size + weight.size + bias.size
                            + n * C_OUT * m_img) * 4,
        ),
    )(xs, w_mat, b_mat)

    # (N, C, Ho*Wo) -> (N, C, Ho, Wo): free reshape, no post-kernel transpose.
    return out.reshape(n, C_OUT, ho, wo)


if __name__ == "__main__":
    key = jax.random.PRNGKey(0)
    kx, kw_key, kb_key = jax.random.split(key, 3)

    # Small shapes consistent with the module: batch=2, channels=6, spatial=16.
    x = jax.random.normal(kx, (2, C_IN, 16, 16), dtype=jnp.float32)
    weight = jax.random.normal(kw_key, (C_OUT, C_IN, KH, KW), dtype=jnp.float32) * 0.1
    bias = jax.random.normal(kb_key, (C_OUT,), dtype=jnp.float32) * 0.1

    out = jax.jit(conv2d_leaky)(x, weight, bias)
    jax.block_until_ready(out)

    # Cross-check against XLA's native conv (f32, highest precision).
    ref = jax.lax.conv_general_dilated(
        x, weight, window_strides=(STRIDE, STRIDE),
        padding=((PAD, PAD), (PAD, PAD)),
        dimension_numbers=("NCHW", "OIHW", "NCHW"),
        precision=jax.lax.Precision.HIGHEST,
    ) + bias.reshape(1, C_OUT, 1, 1)
    ref = jnp.where(ref > 0, ref, ref * 0.1)

    assert out.shape == (2, C_OUT, 8, 8), out.shape
    assert jnp.allclose(out, ref, atol=2e-2, rtol=2e-2), \
        float(jnp.max(jnp.abs(out - ref)))

    print("KERNEL_OK")
</pallas_src>

<mosaic_0001>
module attributes {stable_mosaic.version = 11 : i64} {
  func.func @_conv_leaky_kernel(%arg0: i32, %arg1: memref<1x36x6x9xf32, #tpu.memory_space<vmem>>, %arg2: memref<8x96xf32, #tpu.memory_space<vmem>>, %arg3: memref<8x1xf32, #tpu.memory_space<vmem>>, %arg4: memref<1x6x64xf32, #tpu.memory_space<vmem>>, %arg5: memref<96x64xf32, #tpu.memory_space<vmem>>) attributes {dimension_semantics = [#tpu.dimension_semantics<parallel>], iteration_bounds = array<i64: 2>, scalar_prefetch = 0 : i64, scratch_operands = 1 : i64, tpu.core_type = #tpu.core_type<tc>, window_params = [{transform_indices = @transform_0, window_bounds = array<i64: 1, 36, 6, 9>}, {pipeline_mode = #tpu.pipeline_mode<synchronous>, transform_indices = @transform_1, window_bounds = array<i64: 8, 96>}, {pipeline_mode = #tpu.pipeline_mode<synchronous>, transform_indices = @transform_2, window_bounds = array<i64: 8, 1>}, {transform_indices = @transform_3, window_bounds = array<i64: 1, 6, 64>}]} {
    %c0 = arith.constant 0 : index
    %c0_0 = arith.constant 0 : index
    %c0_1 = arith.constant 0 : index
    %c0_2 = arith.constant 0 : index
    %0 = vector.load %arg1[%c0, %c0_0, %c0_1, %c0_2] : memref<1x36x6x9xf32, #tpu.memory_space<vmem>>, vector<1x1x6x8xf32>
    %1 = vector.shape_cast %0 : vector<1x1x6x8xf32> to vector<6x8xf32>
    %c0_3 = arith.constant 0 : index
    %c0_4 = arith.constant 0 : index
    %2 = vector.load %arg5[%c0_3, %c0_4] : memref<96x64xf32, #tpu.memory_space<vmem>>, vector<6x8xf32>
    tpu.vector_store %arg5[%c0_3, %c0_4], %1 {strides = array<i32>} : memref<96x64xf32, #tpu.memory_space<vmem>>, vector<6x8xf32>,
    %c0_5 = arith.constant 0 : index
    %c18 = arith.constant 18 : index
    %c0_6 = arith.constant 0 : index
    %c0_7 = arith.constant 0 : index
    %3 = vector.load %arg1[%c0_5, %c18, %c0_6, %c0_7] : memref<1x36x6x9xf32, #tpu.memory_space<vmem>>, vector<1x1x6x8xf32>
    %4 = vector.shape_cast %3 : vector<1x1x6x8xf32> to vector<6x8xf32>
    %c6 = arith.constant 6 : index
    %c0_8 = arith.constant 0 : index
    %5 = vector.load %arg5[%c6, %c0_8] : memref<96x64xf32, #tpu.memory_space<vmem>>, vector<6x8xf32>
    tpu.vector_store %arg5[%c6, %c0_8], %4 {strides = array<i32>} : memref<96x64xf32, #tpu.memory_space<vmem>>, vector<6x8xf32>,
    %c0_9 = arith.constant 0 : index
    %c0_10 = arith.constant 0 : index
    %c0_11 = arith.constant 0 : index
    %c1 = arith.constant 1 : index
    %6 = vector.load %arg1[%c0_9, %c0_10, %c0_11, %c1] : memref<1x36x6x9xf32, #tpu.memory_space<vmem>>, vector<1x1x6x8xf32>
    %7 = vector.shape_cast %6 : vector<1x1x6x8xf32> to vector<6x8xf32>
    %c12 = arith.constant 12 : index
    %c0_12 = arith.constant 0 : index
    %8 = vector.load %arg5[%c12, %c0_12] : memref<96x64xf32, #tpu.memory_space<vmem>>, vector<6x8xf32>
    tpu.vector_store %arg5[%c12, %c0_12], %7 {strides = array<i32>} : memref<96x64xf32, #tpu.memory_space<vmem>>, vector<6x8xf32>,
    %c0_13 = arith.constant 0 : index
    %c18_14 = arith.constant 18 : index
    %c0_15 = arith.constant 0 : index
    %c1_16 = arith.constant 1 : index
    %9 = vector.load %arg1[%c0_13, %c18_14, %c0_15, %c1_16] : memref<1x36x6x9xf32, #tpu.memory_space<vmem>>, vector<1x1x6x8xf32>
    %10 = vector.shape_cast %9 : vector<1x1x6x8xf32> to vector<6x8xf32>
    %c18_17 = arith.constant 18 : index
    %c0_18 = arith.constant 0 : index
    %11 = vector.load %arg5[%c18_17, %c0_18] : memref<96x64xf32, #tpu.memory_space<vmem>>, vector<6x8xf32>
    tpu.vector_store %arg5[%c18_17, %c0_18], %10 {strides = array<i32>} : memref<96x64xf32, #tpu.memory_space<vmem>>, vector<6x8xf32>,
    %c0_19 = arith.constant 0 : index
    %c1_20 = arith.constant 1 : index
    %c0_21 = arith.constant 0 : index
    %c0_22 = arith.constant 0 : index
    %12 = vector.load %arg1[%c0_19, %c1_20, %c0_21, %c0_22] : memref<1x36x6x9xf32, #tpu.memory_space<vmem>>, vector<1x1x6x8xf32>
    %13 = vector.shape_cast %12 : vector<1x1x6x8xf32> to vector<6x8xf32>
    %c24 = arith.constant 24 : index
    %c0_23 = arith.constant 0 : index
    %14 = vector.load %arg5[%c24, %c0_23] : memref<96x64xf32, #tpu.memory_space<vmem>>, vector<6x8xf32>
    tpu.vector_store %arg5[%c24, %c0_23], %13 {strides = array<i32>} : memref<96x64xf32, #tpu.memory_space<vmem>>, vector<6x8xf32>,
    %c0_24 = arith.constant 0 : index
    %c19 = arith.constant 19 : index
    %c0_25 = arith.constant 0 : index
    %c0_26 = arith.constant 0 : index
    %15 = vector.load %arg1[%c0_24, %c19, %c0_25, %c0_26] : memref<1x36x6x9xf32, #tpu.memory_space<vmem>>, vector<1x1x6x8xf32>
    %16 = vector.shape_cast %15 : vector<1x1x6x8xf32> to vector<6x8xf32>
    %c30 = arith.constant 30 : index
    %c0_27 = arith.constant 0 : index
    %17 = vector.load %arg5[%c30, %c0_27] : memref<96x64xf32, #tpu.memory_space<vmem>>, vector<6x8xf32>
    tpu.vector_store %arg5[%c30, %c0_27], %16 {strides = array<i32>} : memref<96x64xf32, #tpu.memory_space<vmem>>, vector<6x8xf32>,
    %c0_28 = arith.constant 0 : index
    %c1_29 = arith.constant 1 : index
    %c0_30 = arith.constant 0 : index
    %c1_31 = arith.constant 1 : index
    %18 = vector.load %arg1[%c0_28, %c1_29, %c0_30, %c1_31] : memref<1x36x6x9xf32, #tpu.memory_space<vmem>>, vector<1x1x6x8xf32>
    %19 = vector.shape_cast %18 : vector<1x1x6x8xf32> to vector<6x8xf32>
    %c36 = arith.constant 36 : index
    %c0_32 = arith.constant 0 : index
    %20 = vector.load %arg5[%c36, %c0_32] : memref<96x64xf32, #tpu.memory_space<vmem>>, vector<6x8xf32>
    tpu.vector_store %arg5[%c36, %c0_32], %19 {strides = array<i32>} : memref<96x64xf32, #tpu.memory_space<vmem>>, vector<6x8xf32>,
    %c0_33 = arith.constant 0 : index
    %c19_34 = arith.constant 19 : index
    %c0_35 = arith.constant 0 : index
    %c1_36 = arith.constant 1 : index
    %21 = vector.load %arg1[%c0_33, %c19_34, %c0_35, %c1_36] : memref<1x36x6x9xf32, #tpu.memory_space<vmem>>, vector<1x1x6x8xf32>
    %22 = vector.shape_cast %21 : vector<1x1x6x8xf32> to vector<6x8xf32>
    %c42 = arith.constant 42 : index
    %c0_37 = arith.constant 0 : index
    %23 = vector.load %arg5[%c42, %c0_37] : memref<96x64xf32, #tpu.memory_space<vmem>>, vector<6x8xf32>
    tpu.vector_store %arg5[%c42, %c0_37], %22 {strides = array<i32>} : memref<96x64xf32, #tpu.memory_space<vmem>>, vector<6x8xf32>,
    %c0_38 = arith.constant 0 : index
    %c2 = arith.constant 2 : index
    %c0_39 = arith.constant 0 : index
    %c0_40 = arith.constant 0 : index
    %24 = vector.load %arg1[%c0_38, %c2, %c0_39, %c0_40] : memref<1x36x6x9xf32, #tpu.memory_space<vmem>>, vector<1x1x6x8xf32>
    %25 = vector.shape_cast %24 : vector<1x1x6x8xf32> to vector<6x8xf32>
    %c48 = arith.constant 48 : index
    %c0_41 = arith.constant 0 : index
    %26 = vector.load %arg5[%c48, %c0_41] : memref<96x64xf32, #tpu.memory_space<vmem>>, vector<6x8xf32>
    tpu.vector_store %arg5[%c48, %c0_41], %25 {strides = array<i32>} : memref<96x64xf32, #tpu.memory_space<vmem>>, vector<6x8xf32>,
    %c0_42 = arith.constant 0 : index
    %c20 = arith.constant 20 : index
    %c0_43 = arith.constant 0 : index
    %c0_44 = arith.constant 0 : index
    %27 = vector.load %arg1[%c0_42, %c20, %c0_43, %c0_44] : memref<1x36x6x9xf32, #tpu.memory_space<vmem>>, vector<1x1x6x8xf32>
    %28 = vector.shape_cast %27 : vector<1x1x6x8xf32> to vector<6x8xf32>
    %c54 = arith.constant 54 : index
    %c0_45 = arith.constant 0 : index
    %29 = vector.load %arg5[%c54, %c0_45] : memref<96x64xf32, #tpu.memory_space<vmem>>, vector<6x8xf32>
    tpu.vector_store %arg5[%c54, %c0_45], %28 {strides = array<i32>} : memref<96x64xf32, #tpu.memory_space<vmem>>, vector<6x8xf32>,
    %c0_46 = arith.constant 0 : index
    %c2_47 = arith.constant 2 : index
    %c0_48 = arith.constant 0 : index
    %c1_49 = arith.constant 1 : index
    %30 = vector.load %arg1[%c0_46, %c2_47, %c0_48, %c1_49] : memref<1x36x6x9xf32, #tpu.memory_space<vmem>>, vector<1x1x6x8xf32>
    %31 = vector.shape_cast %30 : vector<1x1x6x8xf32> to vector<6x8xf32>
    %c60 = arith.constant 60 : index
    %c0_50 = arith.constant 0 : index
    %32 = vector.load %arg5[%c60, %c0_50] : memref<96x64xf32, #tpu.memory_space<vmem>>, vector<6x8xf32>
    tpu.vector_store %arg5[%c60, %c0_50], %31 {strides = array<i32>} : memref<96x64xf32, #tpu.memory_space<vmem>>, vector<6x8xf32>,
    %c0_51 = arith.constant 0 : index
    %c20_52 = arith.constant 20 : index
    %c0_53 = arith.constant 0 : index
    %c1_54 = arith.constant 1 : index
    %33 = vector.load %arg1[%c0_51, %c20_52, %c0_53, %c1_54] : memref<1x36x6x9xf32, #tpu.memory_space<vmem>>, vector<1x1x6x8xf32>
    %34 = vector.shape_cast %33 : vector<1x1x6x8xf32> to vector<6x8xf32>
    %c66 = arith.constant 66 : index
    %c0_55 = arith.constant 0 : index
    %35 = vector.load %arg5[%c66, %c0_55] : memref<96x64xf32, #tpu.memory_space<vmem>>, vector<6x8xf32>
    tpu.vector_store %arg5[%c66, %c0_55], %34 {strides = array<i32>} : memref<96x64xf32, #tpu.memory_space<vmem>>, vector<6x8xf32>,
    %c0_56 = arith.constant 0 : index
    %c3 = arith.constant 3 : index
    %c0_57 = arith.constant 0 : index
    %c0_58 = arith.constant 0 : index
    %36 = vector.load %arg1[%c0_56, %c3, %c0_57, %c0_58] : memref<1x36x6x9xf32, #tpu.memory_space<vmem>>, vector<1x1x6x8xf32>
    %37 = vector.shape_cast %36 : vector<1x1x6x8xf32> to vector<6x8xf32>
    %c72 = arith.constant 72 : index
    %c0_59 = arith.constant 0 : index
    %38 = vector.load %arg5[%c72, %c0_59] : memref<96x64xf32, #tpu.memory_space<vmem>>, vector<6x8xf32>
    tpu.vector_store %arg5[%c72, %c0_59], %37 {strides = array<i32>} : memref<96x64xf32, #tpu.memory_space<vmem>>, vector<6x8xf32>,
    %c0_60 = arith.constant 0 : index
    %c21 = arith.constant 21 : index
    %c0_61 = arith.constant 0 : index
    %c0_62 = arith.constant 0 : index
    %39 = vector.load %arg1[%c0_60, %c21, %c0_61, %c0_62] : memref<1x36x6x9xf32, #tpu.memory_space<vmem>>, vector<1x1x6x8xf32>
    %40 = vector.shape_cast %39 : vector<1x1x6x8xf32> to vector<6x8xf32>
    %c78 = arith.constant 78 : index
    %c0_63 = arith.constant 0 : index
    %41 = vector.load %arg5[%c78, %c0_63] : memref<96x64xf32, #tpu.memory_space<vmem>>, vector<6x8xf32>
    tpu.vector_store %arg5[%c78, %c0_63], %40 {strides = array<i32>} : memref<96x64xf32, #tpu.memory_space<vmem>>, vector<6x8xf32>,
    %c0_64 = arith.constant 0 : index
    %c3_65 = arith.constant 3 : index
    %c0_66 = arith.constant 0 : index
    %c1_67 = arith.constant 1 : index
    %42 = vector.load %arg1[%c0_64, %c3_65, %c0_66, %c1_67] : memref<1x36x6x9xf32, #tpu.memory_space<vmem>>, vector<1x1x6x8xf32>
    %43 = vector.shape_cast %42 : vector<1x1x6x8xf32> to vector<6x8xf32>
    %c84 = arith.constant 84 : index
    %c0_68 = arith.constant 0 : index
    %44 = vector.load %arg5[%c84, %c0_68] : memref<96x64xf32, #tpu.memory_space<vmem>>, vector<6x8xf32>
    tpu.vector_store %arg5[%c84, %c0_68], %43 {strides = array<i32>} : memref<96x64xf32, #tpu.memory_space<vmem>>, vector<6x8xf32>,
    %c0_69 = arith.constant 0 : index
    %c21_70 = arith.constant 21 : index
    %c0_71 = arith.constant 0 : index
    %c1_72 = arith.constant 1 : index
    %45 = vector.load %arg1[%c0_69, %c21_70, %c0_71, %c1_72] : memref<1x36x6x9xf32, #tpu.memory_space<vmem>>, vector<1x1x6x8xf32>
    %46 = vector.shape_cast %45 : vector<1x1x6x8xf32> to vector<6x8xf32>
    %c90 = arith.constant 90 : index
    %c0_73 = arith.constant 0 : index
    %47 = vector.load %arg5[%c90, %c0_73] : memref<96x64xf32, #tpu.memory_space<vmem>>, vector<6x8xf32>
    tpu.vector_store %arg5[%c90, %c0_73], %46 {strides = array<i32>} : memref<96x64xf32, #tpu.memory_space<vmem>>, vector<6x8xf32>,
    %c0_74 = arith.constant 0 : index
    %c2_75 = arith.constant 2 : index
    %c0_76 = arith.constant 0 : index
    %c0_77 = arith.constant 0 : index
    %48 = vector.load %arg1[%c0_74, %c2_75, %c0_76, %c0_77] : memref<1x36x6x9xf32, #tpu.memory_space<vmem>>, vector<1x1x6x8xf32>
    %49 = vector.shape_cast %48 : vector<1x1x6x8xf32> to vector<6x8xf32>
    %c0_78 = arith.constant 0 : index
    %c8 = arith.constant 8 : index
    %50 = vector.load %arg5[%c0_78, %c8] : memref<96x64xf32, #tpu.memory_space<vmem>>, vector<6x8xf32>
    tpu.vector_store %arg5[%c0_78, %c8], %49 {strides = array<i32>} : memref<96x64xf32, #tpu.memory_space<vmem>>, vector<6x8xf32>,
    %c0_79 = arith.constant 0 : index
    %c20_80 = arith.constant 20 : index
    %c0_81 = arith.constant 0 : index
    %c0_82 = arith.constant 0 : index
    %51 = vector.load %arg1[%c0_79, %c20_80, %c0_81, %c0_82] : memref<1x36x6x9xf32, #tpu.memory_space<vmem>>, vector<1x1x6x8xf32>
    %52 = vector.shape_cast %51 : vector<1x1x6x8xf32> to vector<6x8xf32>
    %c6_83 = arith.constant 6 : index
    %c8_84 = arith.constant 8 : index
    %53 = vector.load %arg5[%c6_83, %c8_84] : memref<96x64xf32, #tpu.memory_space<vmem>>, vector<6x8xf32>
    tpu.vector_store %arg5[%c6_83, %c8_84], %52 {strides = array<i32>} : memref<96x64xf32, #tpu.memory_space<vmem>>, vector<6x8xf32>,
    %c0_85 = arith.constant 0 : index
    %c2_86 = arith.constant 2 : index
    %c0_87 = arith.constant 0 : index
    %c1_88 = arith.constant 1 : index
    %54 = vector.load %arg1[%c0_85, %c2_86, %c0_87, %c1_88] : memref<1x36x6x9xf32, #tpu.memory_space<vmem>>, vector<1x1x6x8xf32>
    %55 = vector.shape_cast %54 : vector<1x1x6x8xf32> to vector<6x8xf32>
    %c12_89 = arith.constant 12 : index
    %c8_90 = arith.constant 8 : index
    %56 = vector.load %arg5[%c12_89, %c8_90] : memref<96x64xf32, #tpu.memory_space<vmem>>, vector<6x8xf32>
    tpu.vector_store %arg5[%c12_89, %c8_90], %55 {strides = array<i32>} : memref<96x64xf32, #tpu.memory_space<vmem>>, vector<6x8xf32>,
    %c0_91 = arith.constant 0 : index
    %c20_92 = arith.constant 20 : index
    %c0_93 = arith.constant 0 : index
    %c1_94 = arith.constant 1 : index
    %57 = vector.load %arg1[%c0_91, %c20_92, %c0_93, %c1_94] : memref<1x36x6x9xf32, #tpu.memory_space<vmem>>, vector<1x1x6x8xf32>
    %58 = vector.shape_cast %57 : vector<1x1x6x8xf32> to vector<6x8xf32>
    %c18_95 = arith.constant 18 : index
    %c8_96 = arith.constant 8 : index
    %59 = vector.load %arg5[%c18_95, %c8_96] : memref<96x64xf32, #tpu.memory_space<vmem>>, vector<6x8xf32>
    tpu.vector_store %arg5[%c18_95, %c8_96], %58 {strides = array<i32>} : memref<96x64xf32, #tpu.memory_space<vmem>>, vector<6x8xf32>,
    %c0_97 = arith.constant 0 : index
    %c3_98 = arith.constant 3 : index
    %c0_99 = arith.constant 0 : index
    %c0_100 = arith.constant 0 : index
    %60 = vector.load %arg1[%c0_97, %c3_98, %c0_99, %c0_100] : memref<1x36x6x9xf32, #tpu.memory_space<vmem>>, vector<1x1x6x8xf32>
    %61 = vector.shape_cast %60 : vector<1x1x6x8xf32> to vector<6x8xf32>
    %c24_101 = arith.constant 24 : index
    %c8_102 = arith.constant 8 : index
    %62 = vector.load %arg5[%c24_101, %c8_102] : memref<96x64xf32, #tpu.memory_space<vmem>>, vector<6x8xf32>
    tpu.vector_store %arg5[%c24_101, %c8_102], %61 {strides = array<i32>} : memref<96x64xf32, #tpu.memory_space<vmem>>, vector<6x8xf32>,
    %c0_103 = arith.constant 0 : index
    %c21_104 = arith.constant 21 : index
    %c0_105 = arith.constant 0 : index
    %c0_106 = arith.constant 0 : index
    %63 = vector.load %arg1[%c0_103, %c21_104, %c0_105, %c0_106] : memref<1x36x6x9xf32, #tpu.memory_space<vmem>>, vector<1x1x6x8xf32>
    %64 = vector.shape_cast %63 : vector<1x1x6x8xf32> to vector<6x8xf32>
    %c30_107 = arith.constant 30 : index
    %c8_108 = arith.constant 8 : index
    %65 = vector.load %arg5[%c30_107, %c8_108] : memref<96x64xf32, #tpu.memory_space<vmem>>, vector<6x8xf32>
    tpu.vector_store %arg5[%c30_107, %c8_108], %64 {strides = array<i32>} : memref<96x64xf32, #tpu.memory_space<vmem>>, vector<6x8xf32>,
    %c0_109 = arith.constant 0 : index
    %c3_110 = arith.constant 3 : index
    %c0_111 = arith.constant 0 : index
    %c1_112 = arith.constant 1 : index
    %66 = vector.load %arg1[%c0_109, %c3_110, %c0_111, %c1_112] : memref<1x36x6x9xf32, #tpu.memory_space<vmem>>, vector<1x1x6x8xf32>
    %67 = vector.shape_cast %66 : vector<1x1x6x8xf32> to vector<6x8xf32>
    %c36_113 = arith.constant 36 : index
    %c8_114 = arith.constant 8 : index
    %68 = vector.load %arg5[%c36_113, %c8_114] : memref<96x64xf32, #tpu.memory_space<vmem>>, vector<6x8xf32>
    tpu.vector_store %arg5[%c36_113, %c8_114], %67 {strides = array<i32>} : memref<96x64xf32, #tpu.memory_space<vmem>>, vector<6x8xf32>,
    %c0_115 = arith.constant 0 : index
    %c21_116 = arith.constant 21 : index
    %c0_117 = arith.constant 0 : index
    %c1_118 = arith.constant 1 : index
    %69 = vector.load %arg1[%c0_115, %c21_116, %c0_117, %c1_118] : memref<1x36x6x9xf32, #tpu.memory_space<vmem>>, vector<1x1x6x8xf32>
    %70 = vector.shape_cast %69 : vector<1x1x6x8xf32> to vector<6x8xf32>
    %c42_119 = arith.constant 42 : index
    %c8_120 = arith.constant 8 : index
    %71 = vector.load %arg5[%c42_119, %c8_120] : memref<96x64xf32, #tpu.memory_space<vmem>>, vector<6x8xf32>
    tpu.vector_store %arg5[%c42_119, %c8_120], %70 {strides = array<i32>} : memref<96x64xf32, #tpu.memory_space<vmem>>, vector<6x8xf32>,
    %c0_121 = arith.constant 0 : index
    %c4 = arith.constant 4 : index
    %c0_122 = arith.constant 0 : index
    %c0_123 = arith.constant 0 : index
    %72 = vector.load %arg1[%c0_121, %c4, %c0_122, %c0_123] : memref<1x36x6x9xf32, #tpu.memory_space<vmem>>, vector<1x1x6x8xf32>
    %73 = vector.shape_cast %72 : vector<1x1x6x8xf32> to vector<6x8xf32>
    %c48_124 = arith.constant 48 : index
    %c8_125 = arith.constant 8 : index
    %74 = vector.load %arg5[%c48_124, %c8_125] : memref<96x64xf32, #tpu.memory_space<vmem>>, vector<6x8xf32>
    tpu.vector_store %arg5[%c48_124, %c8_125], %73 {strides = array<i32>} : memref<96x64xf32, #tpu.memory_space<vmem>>, vector<6x8xf32>,
    %c0_126 = arith.constant 0 : index
    %c22 = arith.constant 22 : index
    %c0_127 = arith.constant 0 : index
    %c0_128 = arith.constant 0 : index
    %75 = vector.load %arg1[%c0_126, %c22, %c0_127, %c0_128] : memref<1x36x6x9xf32, #tpu.memory_space<vmem>>, vector<1x1x6x8xf32>
    %76 = vector.shape_cast %75 : vector<1x1x6x8xf32> to vector<6x8xf32>
    %c54_129 = arith.constant 54 : index
    %c8_130 = arith.constant 8 : index
    %77 = vector.load %arg5[%c54_129, %c8_130] : memref<96x64xf32, #tpu.memory_space<vmem>>, vector<6x8xf32>
    tpu.vector_store %arg5[%c54_129, %c8_130], %76 {strides = array<i32>} : memref<96x64xf32, #tpu.memory_space<vmem>>, vector<6x8xf32>,
    %c0_131 = arith.constant 0 : index
    %c4_132 = arith.constant 4 : index
    %c0_133 = arith.constant 0 : index
    %c1_134 = arith.constant 1 : index
    %78 = vector.load %arg1[%c0_131, %c4_132, %c0_133, %c1_134] : memref<1x36x6x9xf32, #tpu.memory_space<vmem>>, vector<1x1x6x8xf32>
    %79 = vector.shape_cast %78 : vector<1x1x6x8xf32> to vector<6x8xf32>
    %c60_135 = arith.constant 60 : index
    %c8_136 = arith.constant 8 : index
    %80 = vector.load %arg5[%c60_135, %c8_136] : memref<96x64xf32, #tpu.memory_space<vmem>>, vector<6x8xf32>
    tpu.vector_store %arg5[%c60_135, %c8_136], %79 {strides = array<i32>} : memref<96x64xf32, #tpu.memory_space<vmem>>, vector<6x8xf32>,
    %c0_137 = arith.constant 0 : index
    %c22_138 = arith.constant 22 : index
    %c0_139 = arith.constant 0 : index
    %c1_140 = arith.constant 1 : index
    %81 = vector.load %arg1[%c0_137, %c22_138, %c0_139, %c1_140] : memref<1x36x6x9xf32, #tpu.memory_space<vmem>>, vector<1x1x6x8xf32>
    %82 = vector.shape_cast %81 : vector<1x1x6x8xf32> to vector<6x8xf32>
    %c66_141 = arith.constant 66 : index
    %c8_142 = arith.constant 8 : index
    %83 = vector.load %arg5[%c66_141, %c8_142] : memref<96x64xf32, #tpu.memory_space<vmem>>, vector<6x8xf32>
    tpu.vector_store %arg5[%c66_141, %c8_142], %82 {strides = array<i32>} : memref<96x64xf32, #tpu.memory_space<vmem>>, vector<6x8xf32>,
    %c0_143 = arith.constant 0 : index
    %c5 = arith.constant 5 : index
    %c0_144 = arith.constant 0 : index
    %c0_145 = arith.constant 0 : index
    %84 = vector.load %arg1[%c0_143, %c5, %c0_144, %c0_145] : memref<1x36x6x9xf32, #tpu.memory_space<vmem>>, vector<1x1x6x8xf32>
    %85 = vector.shape_cast %84 : vector<1x1x6x8xf32> to vector<6x8xf32>
    %c72_146 = arith.constant 72 : index
    %c8_147 = arith.constant 8 : index
    %86 = vector.load %arg5[%c72_146, %c8_147] : memref<96x64xf32, #tpu.memory_space<vmem>>, vector<6x8xf32>
    tpu.vector_store %arg5[%c72_146, %c8_147], %85 {strides = array<i32>} : memref<96x64xf32, #tpu.memory_space<vmem>>, vector<6x8xf32>,
    %c0_148 = arith.constant 0 : index
    %c23 = arith.constant 23 : index
    %c0_149 = arith.constant 0 : index
    %c0_150 = arith.constant 0 : index
    %87 = vector.load %arg1[%c0_148, %c23, %c0_149, %c0_150] : memref<1x36x6x9xf32, #tpu.memory_space<vmem>>, vector<1x1x6x8xf32>
    %88 = vector.shape_cast %87 : vector<1x1x6x8xf32> to vector<6x8xf32>
    %c78_151 = arith.constant 78 : index
    %c8_152 = arith.constant 8 : index
    %89 = vector.load %arg5[%c78_151, %c8_152] : memref<96x64xf32, #tpu.memory_space<vmem>>, vector<6x8xf32>
    tpu.vector_store %arg5[%c78_151, %c8_152], %88 {strides = array<i32>} : memref<96x64xf32, #tpu.memory_space<vmem>>, vector<6x8xf32>,
    %c0_153 = arith.constant 0 : index
    %c5_154 = arith.constant 5 : index
    %c0_155 = arith.constant 0 : index
    %c1_156 = arith.constant 1 : index
    %90 = vector.load %arg1[%c0_153, %c5_154, %c0_155, %c1_156] : memref<1x36x6x9xf32, #tpu.memory_space<vmem>>, vector<1x1x6x8xf32>
    %91 = vector.shape_cast %90 : vector<1x1x6x8xf32> to vector<6x8xf32>
    %c84_157 = arith.constant 84 : index
    %c8_158 = arith.constant 8 : index
    %92 = vector.load %arg5[%c84_157, %c8_158] : memref<96x64xf32, #tpu.memory_space<vmem>>, vector<6x8xf32>
    tpu.vector_store %arg5[%c84_157, %c8_158], %91 {strides = array<i32>} : memref<96x64xf32, #tpu.memory_space<vmem>>, vector<6x8xf32>,
    %c0_159 = arith.constant 0 : index
    %c23_160 = arith.constant 23 : index
    %c0_161 = arith.constant 0 : index
    %c1_162 = arith.constant 1 : index
    %93 = vector.load %arg1[%c0_159, %c23_160, %c0_161, %c1_162] : memref<1x36x6x9xf32, #tpu.memory_space<vmem>>, vector<1x1x6x8xf32>
    %94 = vector.shape_cast %93 : vector<1x1x6x8xf32> to vector<6x8xf32>
    %c90_163 = arith.constant 90 : index
    %c8_164 = arith.constant 8 : index
    %95 = vector.load %arg5[%c90_163, %c8_164] : memref<96x64xf32, #tpu.memory_space<vmem>>, vector<6x8xf32>
    tpu.vector_store %arg5[%c90_163, %c8_164], %94 {strides = array<i32>} : memref<96x64xf32, #tpu.memory_space<vmem>>, vector<6x8xf32>,
    %c0_165 = arith.constant 0 : index
    %c4_166 = arith.constant 4 : index
    %c0_167 = arith.constant 0 : index
    %c0_168 = arith.constant 0 : index
    %96 = vector.load %arg1[%c0_165, %c4_166, %c0_167, %c0_168] : memref<1x36x6x9xf32, #tpu.memory_space<vmem>>, vector<1x1x6x8xf32>
    %97 = vector.shape_cast %96 : vector<1x1x6x8xf32> to vector<6x8xf32>
    %c0_169 = arith.constant 0 : index
    %c16 = arith.constant 16 : index
    %98 = vector.load %arg5[%c0_169, %c16] : memref<96x64xf32, #tpu.memory_space<vmem>>, vector<6x8xf32>
    tpu.vector_store %arg5[%c0_169, %c16], %97 {strides = array<i32>} : memref<96x64xf32, #tpu.memory_space<vmem>>, vector<6x8xf32>,
    %c0_170 = arith.constant 0 : index
    %c22_171 = arith.constant 22 : index
    %c0_172 = arith.constant 0 : index
    %c0_173 = arith.constant 0 : index
    %99 = vector.load %arg1[%c0_170, %c22_171, %c0_172, %c0_173] : memref<1x36x6x9xf32, #tpu.memory_space<vmem>>, vector<1x1x6x8xf32>
    %100 = vector.shape_cast %99 : vector<1x1x6x8xf32> to vector<6x8xf32>
    %c6_174 = arith.constant 6 : index
    %c16_175 = arith.constant 16 : index
    %101 = vector.load %arg5[%c6_174, %c16_175] : memref<96x64xf32, #tpu.memory_space<vmem>>, vector<6x8xf32>
    tpu.vector_store %arg5[%c6_174, %c16_175], %100 {strides = array<i32>} : memref<96x64xf32, #tpu.memory_space<vmem>>, vector<6x8xf32>,
    %c0_176 = arith.constant 0 : index
    %c4_177 = arith.constant 4 : index
    %c0_178 = arith.constant 0 : index
    %c1_179 = arith.constant 1 : index
    %102 = vector.load %arg1[%c0_176, %c4_177, %c0_178, %c1_179] : memref<1x36x6x9xf32, #tpu.memory_space<vmem>>, vector<1x1x6x8xf32>
    %103 = vector.shape_cast %102 : vector<1x1x6x8xf32> to vector<6x8xf32>
    %c12_180 = arith.constant 12 : index
    %c16_181 = arith.constant 16 : index
    %104 = vector.load %arg5[%c12_180, %c16_181] : memref<96x64xf32, #tpu.memory_space<vmem>>, vector<6x8xf32>
    tpu.vector_store %arg5[%c12_180, %c16_181], %103 {strides = array<i32>} : memref<96x64xf32, #tpu.memory_space<vmem>>, vector<6x8xf32>,
    %c0_182 = arith.constant 0 : index
    %c22_183 = arith.constant 22 : index
    %c0_184 = arith.constant 0 : index
    %c1_185 = arith.constant 1 : index
    %105 = vector.load %arg1[%c0_182, %c22_183, %c0_184, %c1_185] : memref<1x36x6x9xf32, #tpu.memory_space<vmem>>, vector<1x1x6x8xf32>
    %106 = vector.shape_cast %105 : vector<1x1x6x8xf32> to vector<6x8xf32>
    %c18_186 = arith.constant 18 : index
    %c16_187 = arith.constant 16 : index
    %107 = vector.load %arg5[%c18_186, %c16_187] : memref<96x64xf32, #tpu.memory_space<vmem>>, vector<6x8xf32>
    tpu.vector_store %arg5[%c18_186, %c16_187], %106 {strides = array<i32>} : memref<96x64xf32, #tpu.memory_space<vmem>>, vector<6x8xf32>,
    %c0_188 = arith.constant 0 : index
    %c5_189 = arith.constant 5 : index
    %c0_190 = arith.constant 0 : index
    %c0_191 = arith.constant 0 : index
    %108 = vector.load %arg1[%c0_188, %c5_189, %c0_190, %c0_191] : memref<1x36x6x9xf32, #tpu.memory_space<vmem>>, vector<1x1x6x8xf32>
    %109 = vector.shape_cast %108 : vector<1x1x6x8xf32> to vector<6x8xf32>
    %c24_192 = arith.constant 24 : index
    %c16_193 = arith.constant 16 : index
    %110 = vector.load %arg5[%c24_192, %c16_193] : memref<96x64xf32, #tpu.memory_space<vmem>>, vector<6x8xf32>
    tpu.vector_store %arg5[%c24_192, %c16_193], %109 {strides = array<i32>} : memref<96x64xf32, #tpu.memory_space<vmem>>, vector<6x8xf32>,
    %c0_194 = arith.constant 0 : index
    %c23_195 = arith.constant 23 : index
    %c0_196 = arith.constant 0 : index
    %c0_197 = arith.constant 0 : index
    %111 = vector.load %arg1[%c0_194, %c23_195, %c0_196, %c0_197] : memref<1x36x6x9xf32, #tpu.memory_space<vmem>>, vector<1x1x6x8xf32>
    %112 = vector.shape_cast %111 : vector<1x1x6x8xf32> to vector<6x8xf32>
    %c30_198 = arith.constant 30 : index
    %c16_199 = arith.constant 16 : index
    %113 = vector.load %arg5[%c30_198, %c16_199] : memref<96x64xf32, #tpu.memory_space<vmem>>, vector<6x8xf32>
    tpu.vector_store %arg5[%c30_198, %c16_199], %112 {strides = array<i32>} : memref<96x64xf32, #tpu.memory_space<vmem>>, vector<6x8xf32>,
    %c0_200 = arith.constant 0 : index
    %c5_201 = arith.constant 5 : index
    %c0_202 = arith.constant 0 : index
    %c1_203 = arith.constant 1 : index
    %114 = vector.load %arg1[%c0_200, %c5_201, %c0_202, %c1_203] : memref<1x36x6x9xf32, #tpu.memory_space<vmem>>, vector<1x1x6x8xf32>
    %115 = vector.shape_cast %114 : vector<1x1x6x8xf32> to vector<6x8xf32>
    %c36_204 = arith.constant 36 : index
    %c16_205 = arith.constant 16 : index
    %116 = vector.load %arg5[%c36_204, %c16_205] : memref<96x64xf32, #tpu.memory_space<vmem>>, vector<6x8xf32>
    tpu.vector_store %arg5[%c36_204, %c16_205], %115 {strides = array<i32>} : memref<96x64xf32, #tpu.memory_space<vmem>>, vector<6x8xf32>,
    %c0_206 = arith.constant 0 : index
    %c23_207 = arith.constant 23 : index
    %c0_208 = arith.constant 0 : index
    %c1_209 = arith.constant 1 : index
    %117 = vector.load %arg1[%c0_206, %c23_207, %c0_208, %c1_209] : memref<1x36x6x9xf32, #tpu.memory_space<vmem>>, vector<1x1x6x8xf32>
    %118 = vector.shape_cast %117 : vector<1x1x6x8xf32> to vector<6x8xf32>
    %c42_210 = arith.constant 42 : index
    %c16_211 = arith.constant 16 : index
    %119 = vector.load %arg5[%c42_210, %c16_211] : memref<96x64xf32, #tpu.memory_space<vmem>>, vector<6x8xf32>
    tpu.vector_store %arg5[%c42_210, %c16_211], %118 {strides = array<i32>} : memref<96x64xf32, #tpu.memory_space<vmem>>, vector<6x8xf32>,
    %c0_212 = arith.constant 0 : index
    %c6_213 = arith.constant 6 : index
    %c0_214 = arith.constant 0 : index
    %c0_215 = arith.constant 0 : index
    %120 = vector.load %arg1[%c0_212, %c6_213, %c0_214, %c0_215] : memref<1x36x6x9xf32, #tpu.memory_space<vmem>>, vector<1x1x6x8xf32>
    %121 = vector.shape_cast %120 : vector<1x1x6x8xf32> to vector<6x8xf32>
    %c48_216 = arith.constant 48 : index
    %c16_217 = arith.constant 16 : index
    %122 = vector.load %arg5[%c48_216, %c16_217] : memref<96x64xf32, #tpu.memory_space<vmem>>, vector<6x8xf32>
    tpu.vector_store %arg5[%c48_216, %c16_217], %121 {strides = array<i32>} : memref<96x64xf32, #tpu.memory_space<vmem>>, vector<6x8xf32>,
    %c0_218 = arith.constant 0 : index
    %c24_219 = arith.constant 24 : index
    %c0_220 = arith.constant 0 : index
    %c0_221 = arith.constant 0 : index
    %123 = vector.load %arg1[%c0_218, %c24_219, %c0_220, %c0_221] : memref<1x36x6x9xf32, #tpu.memory_space<vmem>>, vector<1x1x6x8xf32>
    %124 = vector.shape_cast %123 : vector<1x1x6x8xf32> to vector<6x8xf32>
    %c54_222 = arith.constant 54 : index
    %c16_223 = arith.constant 16 : index
    %125 = vector.load %arg5[%c54_222, %c16_223] : memref<96x64xf32, #tpu.memory_space<vmem>>, vector<6x8xf32>
    tpu.vector_store %arg5[%c54_222, %c16_223], %124 {strides = array<i32>} : memref<96x64xf32, #tpu.memory_space<vmem>>, vector<6x8xf32>,
    %c0_224 = arith.constant 0 : index
    %c6_225 = arith.constant 6 : index
    %c0_226 = arith.constant 0 : index
    %c1_227 = arith.constant 1 : index
    %126 = vector.load %arg1[%c0_224, %c6_225, %c0_226, %c1_227] : memref<1x36x6x9xf32, #tpu.memory_space<vmem>>, vector<1x1x6x8xf32>
    %127 = vector.shape_cast %126 : vector<1x1x6x8xf32> to vector<6x8xf32>
    %c60_228 = arith.constant 60 : index
    %c16_229 = arith.constant 16 : index
    %128 = vector.load %arg5[%c60_228, %c16_229] : memref<96x64xf32, #tpu.memory_space<vmem>>, vector<6x8xf32>
    tpu.vector_store %arg5[%c60_228, %c16_229], %127 {strides = array<i32>} : memref<96x64xf32, #tpu.memory_space<vmem>>, vector<6x8xf32>,
    %c0_230 = arith.constant 0 : index
    %c24_231 = arith.constant 24 : index
    %c0_232 = arith.constant 0 : index
    %c1_233 = arith.constant 1 : index
    %129 = vector.load %arg1[%c0_230, %c24_231, %c0_232, %c1_233] : memref<1x36x6x9xf32, #tpu.memory_space<vmem>>, vector<1x1x6x8xf32>
    %130 = vector.shape_cast %129 : vector<1x1x6x8xf32> to vector<6x8xf32>
    %c66_234 = arith.constant 66 : index
    %c16_235 = arith.constant 16 : index
    %131 = vector.load %arg5[%c66_234, %c16_235] : memref<96x64xf32, #tpu.memory_space<vmem>>, vector<6x8xf32>
    tpu.vector_store %arg5[%c66_234, %c16_235], %130 {strides = array<i32>} : memref<96x64xf32, #tpu.memory_space<vmem>>, vector<6x8xf32>,
    %c0_236 = arith.constant 0 : index
    %c7 = arith.constant 7 : index
    %c0_237 = arith.constant 0 : index
    %c0_238 = arith.constant 0 : index
    %132 = vector.load %arg1[%c0_236, %c7, %c0_237, %c0_238] : memref<1x36x6x9xf32, #tpu.memory_space<vmem>>, vector<1x1x6x8xf32>
    %133 = vector.shape_cast %132 : vector<1x1x6x8xf32> to vector<6x8xf32>
    %c72_239 = arith.constant 72 : index
    %c16_240 = arith.constant 16 : index
    %134 = vector.load %arg5[%c72_239, %c16_240] : memref<96x64xf32, #tpu.memory_space<vmem>>, vector<6x8xf32>
    tpu.vector_store %arg5[%c72_239, %c16_240], %133 {strides = array<i32>} : memref<96x64xf32, #tpu.memory_space<vmem>>, vector<6x8xf32>,
    %c0_241 = arith.constant 0 : index
    %c25 = arith.constant 25 : index
    %c0_242 = arith.constant 0 : index
    %c0_243 = arith.constant 0 : index
    %135 = vector.load %arg1[%c0_241, %c25, %c0_242, %c0_243] : memref<1x36x6x9xf32, #tpu.memory_space<vmem>>, vector<1x1x6x8xf32>
    %136 = vector.shape_cast %135 : vector<1x1x6x8xf32> to vector<6x8xf32>
    %c78_244 = arith.constant 78 : index
    %c16_245 = arith.constant 16 : index
    %137 = vector.load %arg5[%c78_244, %c16_245] : memref<96x64xf32, #tpu.memory_space<vmem>>, vector<6x8xf32>
    tpu.vector_store %arg5[%c78_244, %c16_245], %136 {strides = array<i32>} : memref<96x64xf32, #tpu.memory_space<vmem>>, vector<6x8xf32>,
    %c0_246 = arith.constant 0 : index
    %c7_247 = arith.constant 7 : index
    %c0_248 = arith.constant 0 : index
    %c1_249 = arith.constant 1 : index
    %138 = vector.load %arg1[%c0_246, %c7_247, %c0_248, %c1_249] : memref<1x36x6x9xf32, #tpu.memory_space<vmem>>, vector<1x1x6x8xf32>
    %139 = vector.shape_cast %138 : vector<1x1x6x8xf32> to vector<6x8xf32>
    %c84_250 = arith.constant 84 : index
    %c16_251 = arith.constant 16 : index
    %140 = vector.load %arg5[%c84_250, %c16_251] : memref<96x64xf32, #tpu.memory_space<vmem>>, vector<6x8xf32>
    tpu.vector_store %arg5[%c84_250, %c16_251], %139 {strides = array<i32>} : memref<96x64xf32, #tpu.memory_space<vmem>>, vector<6x8xf32>,
    %c0_252 = arith.constant 0 : index
    %c25_253 = arith.constant 25 : index
    %c0_254 = arith.constant 0 : index
    %c1_255 = arith.constant 1 : index
    %141 = vector.load %arg1[%c0_252, %c25_253, %c0_254, %c1_255] : memref<1x36x6x9xf32, #tpu.memory_space<vmem>>, vector<1x1x6x8xf32>
    %142 = vector.shape_cast %141 : vector<1x1x6x8xf32> to vector<6x8xf32>
    %c90_256 = arith.constant 90 : index
    %c16_257 = arith.constant 16 : index
    %143 = vector.load %arg5[%c90_256, %c16_257] : memref<96x64xf32, #tpu.memory_space<vmem>>, vector<6x8xf32>
    tpu.vector_store %arg5[%c90_256, %c16_257], %142 {strides = array<i32>} : memref<96x64xf32, #tpu.memory_space<vmem>>, vector<6x8xf32>,
    %c0_258 = arith.constant 0 : index
    %c6_259 = arith.constant 6 : index
    %c0_260 = arith.constant 0 : index
    %c0_261 = arith.constant 0 : index
    %144 = vector.load %arg1[%c0_258, %c6_259, %c0_260, %c0_261] : memref<1x36x6x9xf32, #tpu.memory_space<vmem>>, vector<1x1x6x8xf32>
    %145 = vector.shape_cast %144 : vector<1x1x6x8xf32> to vector<6x8xf32>
    %c0_262 = arith.constant 0 : index
    %c24_263 = arith.constant 24 : index
    %146 = vector.load %arg5[%c0_262, %c24_263] : memref<96x64xf32, #tpu.memory_space<vmem>>, vector<6x8xf32>
    tpu.vector_store %arg5[%c0_262, %c24_263], %145 {strides = array<i32>} : memref<96x64xf32, #tpu.memory_space<vmem>>, vector<6x8xf32>,
    %c0_264 = arith.constant 0 : index
    %c24_265 = arith.constant 24 : index
    %c0_266 = arith.constant 0 : index
    %c0_267 = arith.constant 0 : index
    %147 = vector.load %arg1[%c0_264, %c24_265, %c0_266, %c0_267] : memref<1x36x6x9xf32, #tpu.memory_space<vmem>>, vector<1x1x6x8xf32>
    %148 = vector.shape_cast %147 : vector<1x1x6x8xf32> to vector<6x8xf32>
    %c6_268 = arith.constant 6 : index
    %c24_269 = arith.constant 24 : index
    %149 = vector.load %arg5[%c6_268, %c24_269] : memref<96x64xf32, #tpu.memory_space<vmem>>, vector<6x8xf32>
    tpu.vector_store %arg5[%c6_268, %c24_269], %148 {strides = array<i32>} : memref<96x64xf32, #tpu.memory_space<vmem>>, vector<6x8xf32>,
    %c0_270 = arith.constant 0 : index
    %c6_271 = arith.constant 6 : index
    %c0_272 = arith.constant 0 : index
    %c1_273 = arith.constant 1 : index
    %150 = vector.load %arg1[%c0_270, %c6_271, %c0_272, %c1_273] : memref<1x36x6x9xf32, #tpu.memory_space<vmem>>, vector<1x1x6x8xf32>
    %151 = vector.shape_cast %150 : vector<1x1x6x8xf32> to vector<6x8xf32>
    %c12_274 = arith.constant 12 : index
    %c24_275 = arith.constant 24 : index
    %152 = vector.load %arg5[%c12_274, %c24_275] : memref<96x64xf32, #tpu.memory_space<vmem>>, vector<6x8xf32>
    tpu.vector_store %arg5[%c12_274, %c24_275], %151 {strides = array<i32>} : memref<96x64xf32, #tpu.memory_space<vmem>>, vector<6x8xf32>,
    %c0_276 = arith.constant 0 : index
    %c24_277 = arith.constant 24 : index
    %c0_278 = arith.constant 0 : index
    %c1_279 = arith.constant 1 : index
    %153 = vector.load %arg1[%c0_276, %c24_277, %c0_278, %c1_279] : memref<1x36x6x9xf32, #tpu.memory_space<vmem>>, vector<1x1x6x8xf32>
    %154 = vector.shape_cast %153 : vector<1x1x6x8xf32> to vector<6x8xf32>
    %c18_280 = arith.constant 18 : index
    %c24_281 = arith.constant 24 : index
    %155 = vector.load %arg5[%c18_280, %c24_281] : memref<96x64xf32, #tpu.memory_space<vmem>>, vector<6x8xf32>
    tpu.vector_store %arg5[%c18_280, %c24_281], %154 {strides = array<i32>} : memref<96x64xf32, #tpu.memory_space<vmem>>, vector<6x8xf32>,
    %c0_282 = arith.constant 0 : index
    %c7_283 = arith.constant 7 : index
    %c0_284 = arith.constant 0 : index
    %c0_285 = arith.constant 0 : index
    %156 = vector.load %arg1[%c0_282, %c7_283, %c0_284, %c0_285] : memref<1x36x6x9xf32, #tpu.memory_space<vmem>>, vector<1x1x6x8xf32>
    %157 = vector.shape_cast %156 : vector<1x1x6x8xf32> to vector<6x8xf32>
    %c24_286 = arith.constant 24 : index
    %c24_287 = arith.constant 24 : index
    %158 = vector.load %arg5[%c24_286, %c24_287] : memref<96x64xf32, #tpu.memory_space<vmem>>, vector<6x8xf32>
    tpu.vector_store %arg5[%c24_286, %c24_287], %157 {strides = array<i32>} : memref<96x64xf32, #tpu.memory_space<vmem>>, vector<6x8xf32>,
    %c0_288 = arith.constant 0 : index
    %c25_289 = arith.constant 25 : index
    %c0_290 = arith.constant 0 : index
    %c0_291 = arith.constant 0 : index
    %159 = vector.load %arg1[%c0_288, %c25_289, %c0_290, %c0_291] : memref<1x36x6x9xf32, #tpu.memory_space<vmem>>, vector<1x1x6x8xf32>
    %160 = vector.shape_cast %159 : vector<1x1x6x8xf32> to vector<6x8xf32>
    %c30_292 = arith.constant 30 : index
    %c24_293 = arith.constant 24 : index
    %161 = vector.load %arg5[%c30_292, %c24_293] : memref<96x64xf32, #tpu.memory_space<vmem>>, vector<6x8xf32>
    tpu.vector_store %arg5[%c30_292, %c24_293], %160 {strides = array<i32>} : memref<96x64xf32, #tpu.memory_space<vmem>>, vector<6x8xf32>,
    %c0_294 = arith.constant 0 : index
    %c7_295 = arith.constant 7 : index
    %c0_296 = arith.constant 0 : index
    %c1_297 = arith.constant 1 : index
    %162 = vector.load %arg1[%c0_294, %c7_295, %c0_296, %c1_297] : memref<1x36x6x9xf32, #tpu.memory_space<vmem>>, vector<1x1x6x8xf32>
    %163 = vector.shape_cast %162 : vector<1x1x6x8xf32> to vector<6x8xf32>
    %c36_298 = arith.constant 36 : index
    %c24_299 = arith.constant 24 : index
    %164 = vector.load %arg5[%c36_298, %c24_299] : memref<96x64xf32, #tpu.memory_space<vmem>>, vector<6x8xf32>
    tpu.vector_store %arg5[%c36_298, %c24_299], %163 {strides = array<i32>} : memref<96x64xf32, #tpu.memory_space<vmem>>, vector<6x8xf32>,
    %c0_300 = arith.constant 0 : index
    %c25_301 = arith.constant 25 : index
    %c0_302 = arith.constant 0 : index
    %c1_303 = arith.constant 1 : index
    %165 = vector.load %arg1[%c0_300, %c25_301, %c0_302, %c1_303] : memref<1x36x6x9xf32, #tpu.memory_space<vmem>>, vector<1x1x6x8xf32>
    %166 = vector.shape_cast %165 : vector<1x1x6x8xf32> to vector<6x8xf32>
    %c42_304 = arith.constant 42 : index
    %c24_305 = arith.constant 24 : index
    %167 = vector.load %arg5[%c42_304, %c24_305] : memref<96x64xf32, #tpu.memory_space<vmem>>, vector<6x8xf32>
    tpu.vector_store %arg5[%c42_304, %c24_305], %166 {strides = array<i32>} : memref<96x64xf32, #tpu.memory_space<vmem>>, vector<6x8xf32>,
    %c0_306 = arith.constant 0 : index
    %c8_307 = arith.constant 8 : index
    %c0_308 = arith.constant 0 : index
    %c0_309 = arith.constant 0 : index
    %168 = vector.load %arg1[%c0_306, %c8_307, %c0_308, %c0_309] : memref<1x36x6x9xf32, #tpu.memory_space<vmem>>, vector<1x1x6x8xf32>
    %169 = vector.shape_cast %168 : vector<1x1x6x8xf32> to vector<6x8xf32>
    %c48_310 = arith.constant 48 : index
    %c24_311 = arith.constant 24 : index
    %170 = vector.load %arg5[%c48_310, %c24_311] : memref<96x64xf32, #tpu.memory_space<vmem>>, vector<6x8xf32>
    tpu.vector_store %arg5[%c48_310, %c24_311], %169 {strides = array<i32>} : memref<96x64xf32, #tpu.memory_space<vmem>>, vector<6x8xf32>,
    %c0_312 = arith.constant 0 : index
    %c26 = arith.constant 26 : index
    %c0_313 = arith.constant 0 : index
    %c0_314 = arith.constant 0 : index
    %171 = vector.load %arg1[%c0_312, %c26, %c0_313, %c0_314] : memref<1x36x6x9xf32, #tpu.memory_space<vmem>>, vector<1x1x6x8xf32>
    %172 = vector.shape_cast %171 : vector<1x1x6x8xf32> to vector<6x8xf32>
    %c54_315 = arith.constant 54 : index
    %c24_316 = arith.constant 24 : index
    %173 = vector.load %arg5[%c54_315, %c24_316] : memref<96x64xf32, #tpu.memory_space<vmem>>, vector<6x8xf32>
    tpu.vector_store %arg5[%c54_315, %c24_316], %172 {strides = array<i32>} : memref<96x64xf32, #tpu.memory_space<vmem>>, vector<6x8xf32>,
    %c0_317 = arith.constant 0 : index
    %c8_318 = arith.constant 8 : index
    %c0_319 = arith.constant 0 : index
    %c1_320 = arith.constant 1 : index
    %174 = vector.load %arg1[%c0_317, %c8_318, %c0_319, %c1_320] : memref<1x36x6x9xf32, #tpu.memory_space<vmem>>, vector<1x1x6x8xf32>
    %175 = vector.shape_cast %174 : vector<1x1x6x8xf32> to vector<6x8xf32>
    %c60_321 = arith.constant 60 : index
    %c24_322 = arith.constant 24 : index
    %176 = vector.load %arg5[%c60_321, %c24_322] : memref<96x64xf32, #tpu.memory_space<vmem>>, vector<6x8xf32>
    tpu.vector_store %arg5[%c60_321, %c24_322], %175 {strides = array<i32>} : memref<96x64xf32, #tpu.memory_space<vmem>>, vector<6x8xf32>,
    %c0_323 = arith.constant 0 : index
    %c26_324 = arith.constant 26 : index
    %c0_325 = arith.constant 0 : index
    %c1_326 = arith.constant 1 : index
    %177 = vector.load %arg1[%c0_323, %c26_324, %c0_325, %c1_326] : memref<1x36x6x9xf32, #tpu.memory_space<vmem>>, vector<1x1x6x8xf32>
    %178 = vector.shape_cast %177 : vector<1x1x6x8xf32> to vector<6x8xf32>
    %c66_327 = arith.constant 66 : index
    %c24_328 = arith.constant 24 : index
    %179 = vector.load %arg5[%c66_327, %c24_328] : memref<96x64xf32, #tpu.memory_space<vmem>>, vector<6x8xf32>
    tpu.vector_store %arg5[%c66_327, %c24_328], %178 {strides = array<i32>} : memref<96x64xf32, #tpu.memory_space<vmem>>, vector<6x8xf32>,
    %c0_329 = arith.constant 0 : index
    %c9 = arith.constant 9 : index
    %c0_330 = arith.constant 0 : index
    %c0_331 = arith.constant 0 : index
    %180 = vector.load %arg1[%c0_329, %c9, %c0_330, %c0_331] : memref<1x36x6x9xf32, #tpu.memory_space<vmem>>, vector<1x1x6x8xf32>
    %181 = vector.shape_cast %180 : vector<1x1x6x8xf32> to vector<6x8xf32>
    %c72_332 = arith.constant 72 : index
    %c24_333 = arith.constant 24 : index
    %182 = vector.load %arg5[%c72_332, %c24_333] : memref<96x64xf32, #tpu.memory_space<vmem>>, vector<6x8xf32>
    tpu.vector_store %arg5[%c72_332, %c24_333], %181 {strides = array<i32>} : memref<96x64xf32, #tpu.memory_space<vmem>>, vector<6x8xf32>,
    %c0_334 = arith.constant 0 : index
    %c27 = arith.constant 27 : index
    %c0_335 = arith.constant 0 : index
    %c0_336 = arith.constant 0 : index
    %183 = vector.load %arg1[%c0_334, %c27, %c0_335, %c0_336] : memref<1x36x6x9xf32, #tpu.memory_space<vmem>>, vector<1x1x6x8xf32>
    %184 = vector.shape_cast %183 : vector<1x1x6x8xf32> to vector<6x8xf32>
    %c78_337 = arith.constant 78 : index
    %c24_338 = arith.constant 24 : index
    %185 = vector.load %arg5[%c78_337, %c24_338] : memref<96x64xf32, #tpu.memory_space<vmem>>, vector<6x8xf32>
    tpu.vector_store %arg5[%c78_337, %c24_338], %184 {strides = array<i32>} : memref<96x64xf32, #tpu.memory_space<vmem>>, vector<6x8xf32>,
    %c0_339 = arith.constant 0 : index
    %c9_340 = arith.constant 9 : index
    %c0_341 = arith.constant 0 : index
    %c1_342 = arith.constant 1 : index
    %186 = vector.load %arg1[%c0_339, %c9_340, %c0_341, %c1_342] : memref<1x36x6x9xf32, #tpu.memory_space<vmem>>, vector<1x1x6x8xf32>
    %187 = vector.shape_cast %186 : vector<1x1x6x8xf32> to vector<6x8xf32>
    %c84_343 = arith.constant 84 : index
    %c24_344 = arith.constant 24 : index
    %188 = vector.load %arg5[%c84_343, %c24_344] : memref<96x64xf32, #tpu.memory_space<vmem>>, vector<6x8xf32>
    tpu.vector_store %arg5[%c84_343, %c24_344], %187 {strides = array<i32>} : memref<96x64xf32, #tpu.memory_space<vmem>>, vector<6x8xf32>,
    %c0_345 = arith.constant 0 : index
    %c27_346 = arith.constant 27 : index
    %c0_347 = arith.constant 0 : index
    %c1_348 = arith.constant 1 : index
    %189 = vector.load %arg1[%c0_345, %c27_346, %c0_347, %c1_348] : memref<1x36x6x9xf32, #tpu.memory_space<vmem>>, vector<1x1x6x8xf32>
    %190 = vector.shape_cast %189 : vector<1x1x6x8xf32> to vector<6x8xf32>
    %c90_349 = arith.constant 90 : index
    %c24_350 = arith.constant 24 : index
    %191 = vector.load %arg5[%c90_349, %c24_350] : memref<96x64xf32, #tpu.memory_space<vmem>>, vector<6x8xf32>
    tpu.vector_store %arg5[%c90_349, %c24_350], %190 {strides = array<i32>} : memref<96x64xf32, #tpu.memory_space<vmem>>, vector<6x8xf32>,
    %c0_351 = arith.constant 0 : index
    %c8_352 = arith.constant 8 : index
    %c0_353 = arith.constant 0 : index
    %c0_354 = arith.constant 0 : index
    %192 = vector.load %arg1[%c0_351, %c8_352, %c0_353, %c0_354] : memref<1x36x6x9xf32, #tpu.memory_space<vmem>>, vector<1x1x6x8xf32>
    %193 = vector.shape_cast %192 : vector<1x1x6x8xf32> to vector<6x8xf32>
    %c0_355 = arith.constant 0 : index
    %c32 = arith.constant 32 : index
    %194 = vector.load %arg5[%c0_355, %c32] : memref<96x64xf32, #tpu.memory_space<vmem>>, vector<6x8xf32>
    tpu.vector_store %arg5[%c0_355, %c32], %193 {strides = array<i32>} : memref<96x64xf32, #tpu.memory_space<vmem>>, vector<6x8xf32>,
    %c0_356 = arith.constant 0 : index
    %c26_357 = arith.constant 26 : index
    %c0_358 = arith.constant 0 : index
    %c0_359 = arith.constant 0 : index
    %195 = vector.load %arg1[%c0_356, %c26_357, %c0_358, %c0_359] : memref<1x36x6x9xf32, #tpu.memory_space<vmem>>, vector<1x1x6x8xf32>
    %196 = vector.shape_cast %195 : vector<1x1x6x8xf32> to vector<6x8xf32>
    %c6_360 = arith.constant 6 : index
    %c32_361 = arith.constant 32 : index
    %197 = vector.load %arg5[%c6_360, %c32_361] : memref<96x64xf32, #tpu.memory_space<vmem>>, vector<6x8xf32>
    tpu.vector_store %arg5[%c6_360, %c32_361], %196 {strides = array<i32>} : memref<96x64xf32, #tpu.memory_space<vmem>>, vector<6x8xf32>,
    %c0_362 = arith.constant 0 : index
    %c8_363 = arith.constant 8 : index
    %c0_364 = arith.constant 0 : index
    %c1_365 = arith.constant 1 : index
    %198 = vector.load %arg1[%c0_362, %c8_363, %c0_364, %c1_365] : memref<1x36x6x9xf32, #tpu.memory_space<vmem>>, vector<1x1x6x8xf32>
    %199 = vector.shape_cast %198 : vector<1x1x6x8xf32> to vector<6x8xf32>
    %c12_366 = arith.constant 12 : index
    %c32_367 = arith.constant 32 : index
    %200 = vector.load %arg5[%c12_366, %c32_367] : memref<96x64xf32, #tpu.memory_space<vmem>>, vector<6x8xf32>
    tpu.vector_store %arg5[%c12_366, %c32_367], %199 {strides = array<i32>} : memref<96x64xf32, #tpu.memory_space<vmem>>, vector<6x8xf32>,
    %c0_368 = arith.constant 0 : index
    %c26_369 = arith.constant 26 : index
    %c0_370 = arith.constant 0 : index
    %c1_371 = arith.constant 1 : index
    %201 = vector.load %arg1[%c0_368, %c26_369, %c0_370, %c1_371] : memref<1x36x6x9xf32, #tpu.memory_space<vmem>>, vector<1x1x6x8xf32>
    %202 = vector.shape_cast %201 : vector<1x1x6x8xf32> to vector<6x8xf32>
    %c18_372 = arith.constant 18 : index
    %c32_373 = arith.constant 32 : index
    %203 = vector.load %arg5[%c18_372, %c32_373] : memref<96x64xf32, #tpu.memory_space<vmem>>, vector<6x8xf32>
    tpu.vector_store %arg5[%c18_372, %c32_373], %202 {strides = array<i32>} : memref<96x64xf32, #tpu.memory_space<vmem>>, vector<6x8xf32>,
    %c0_374 = arith.constant 0 : index
    %c9_375 = arith.constant 9 : index
    %c0_376 = arith.constant 0 : index
    %c0_377 = arith.constant 0 : index
    %204 = vector.load %arg1[%c0_374, %c9_375, %c0_376, %c0_377] : memref<1x36x6x9xf32, #tpu.memory_space<vmem>>, vector<1x1x6x8xf32>
    %205 = vector.shape_cast %204 : vector<1x1x6x8xf32> to vector<6x8xf32>
    %c24_378 = arith.constant 24 : index
    %c32_379 = arith.constant 32 : index
    %206 = vector.load %arg5[%c24_378, %c32_379] : memref<96x64xf32, #tpu.memory_space<vmem>>, vector<6x8xf32>
    tpu.vector_store %arg5[%c24_378, %c32_379], %205 {strides = array<i32>} : memref<96x64xf32, #tpu.memory_space<vmem>>, vector<6x8xf32>,
    %c0_380 = arith.constant 0 : index
    %c27_381 = arith.constant 27 : index
    %c0_382 = arith.constant 0 : index
    %c0_383 = arith.constant 0 : index
    %207 = vector.load %arg1[%c0_380, %c27_381, %c0_382, %c0_383] : memref<1x36x6x9xf32, #tpu.memory_space<vmem>>, vector<1x1x6x8xf32>
    %208 = vector.shape_cast %207 : vector<1x1x6x8xf32> to vector<6x8xf32>
    %c30_384 = arith.constant 30 : index
    %c32_385 = arith.constant 32 : index
    %209 = vector.load %arg5[%c30_384, %c32_385] : memref<96x64xf32, #tpu.memory_space<vmem>>, vector<6x8xf32>
    tpu.vector_store %arg5[%c30_384, %c32_385], %208 {strides = array<i32>} : memref<96x64xf32, #tpu.memory_space<vmem>>, vector<6x8xf32>,
    %c0_386 = arith.constant 0 : index
    %c9_387 = arith.constant 9 : index
    %c0_388 = arith.constant 0 : index
    %c1_389 = arith.constant 1 : index
    %210 = vector.load %arg1[%c0_386, %c9_387, %c0_388, %c1_389] : memref<1x36x6x9xf32, #tpu.memory_space<vmem>>, vector<1x1x6x8xf32>
    %211 = vector.shape_cast %210 : vector<1x1x6x8xf32> to vector<6x8xf32>
    %c36_390 = arith.constant 36 : index
    %c32_391 = arith.constant 32 : index
    %212 = vector.load %arg5[%c36_390, %c32_391] : memref<96x64xf32, #tpu.memory_space<vmem>>, vector<6x8xf32>
    tpu.vector_store %arg5[%c36_390, %c32_391], %211 {strides = array<i32>} : memref<96x64xf32, #tpu.memory_space<vmem>>, vector<6x8xf32>,
    %c0_392 = arith.constant 0 : index
    %c27_393 = arith.constant 27 : index
    %c0_394 = arith.constant 0 : index
    %c1_395 = arith.constant 1 : index
    %213 = vector.load %arg1[%c0_392, %c27_393, %c0_394, %c1_395] : memref<1x36x6x9xf32, #tpu.memory_space<vmem>>, vector<1x1x6x8xf32>
    %214 = vector.shape_cast %213 : vector<1x1x6x8xf32> to vector<6x8xf32>
    %c42_396 = arith.constant 42 : index
    %c32_397 = arith.constant 32 : index
    %215 = vector.load %arg5[%c42_396, %c32_397] : memref<96x64xf32, #tpu.memory_space<vmem>>, vector<6x8xf32>
    tpu.vector_store %arg5[%c42_396, %c32_397], %214 {strides = array<i32>} : memref<96x64xf32, #tpu.memory_space<vmem>>, vector<6x8xf32>,
    %c0_398 = arith.constant 0 : index
    %c10 = arith.constant 10 : index
    %c0_399 = arith.constant 0 : index
    %c0_400 = arith.constant 0 : index
    %216 = vector.load %arg1[%c0_398, %c10, %c0_399, %c0_400] : memref<1x36x6x9xf32, #tpu.memory_space<vmem>>, vector<1x1x6x8xf32>
    %217 = vector.shape_cast %216 : vector<1x1x6x8xf32> to vector<6x8xf32>
    %c48_401 = arith.constant 48 : index
    %c32_402 = arith.constant 32 : index
    %218 = vector.load %arg5[%c48_401, %c32_402] : memref<96x64xf32, #tpu.memory_space<vmem>>, vector<6x8xf32>
    tpu.vector_store %arg5[%c48_401, %c32_402], %217 {strides = array<i32>} : memref<96x64xf32, #tpu.memory_space<vmem>>, vector<6x8xf32>,
    %c0_403 = arith.constant 0 : index
    %c28 = arith.constant 28 : index
    %c0_404 = arith.constant 0 : index
    %c0_405 = arith.constant 0 : index
    %219 = vector.load %arg1[%c0_403, %c28, %c0_404, %c0_405] : memref<1x36x6x9xf32, #tpu.memory_space<vmem>>, vector<1x1x6x8xf32>
    %220 = vector.shape_cast %219 : vector<1x1x6x8xf32> to vector<6x8xf32>
    %c54_406 = arith.constant 54 : index
    %c32_407 = arith.constant 32 : index
    %221 = vector.load %arg5[%c54_406, %c32_407] : memref<96x64xf32, #tpu.memory_space<vmem>>, vector<6x8xf32>
    tpu.vector_store %arg5[%c54_406, %c32_407], %220 {strides = array<i32>} : memref<96x64xf32, #tpu.memory_space<vmem>>, vector<6x8xf32>,
    %c0_408 = arith.constant 0 : index
    %c10_409 = arith.constant 10 : index
    %c0_410 = arith.constant 0 : index
    %c1_411 = arith.constant 1 : index
    %222 = vector.load %arg1[%c0_408, %c10_409, %c0_410, %c1_411] : memref<1x36x6x9xf32, #tpu.memory_space<vmem>>, vector<1x1x6x8xf32>
    %223 = vector.shape_cast %222 : vector<1x1x6x8xf32> to vector<6x8xf32>
    %c60_412 = arith.constant 60 : index
    %c32_413 = arith.constant 32 : index
    %224 = vector.load %arg5[%c60_412, %c32_413] : memref<96x64xf32, #tpu.memory_space<vmem>>, vector<6x8xf32>
    tpu.vector_store %arg5[%c60_412, %c32_413], %223 {strides = array<i32>} : memref<96x64xf32, #tpu.memory_space<vmem>>, vector<6x8xf32>,
    %c0_414 = arith.constant 0 : index
    %c28_415 = arith.constant 28 : index
    %c0_416 = arith.constant 0 : index
    %c1_417 = arith.constant 1 : index
    %225 = vector.load %arg1[%c0_414, %c28_415, %c0_416, %c1_417] : memref<1x36x6x9xf32, #tpu.memory_space<vmem>>, vector<1x1x6x8xf32>
    %226 = vector.shape_cast %225 : vector<1x1x6x8xf32> to vector<6x8xf32>
    %c66_418 = arith.constant 66 : index
    %c32_419 = arith.constant 32 : index
    %227 = vector.load %arg5[%c66_418, %c32_419] : memref<96x64xf32, #tpu.memory_space<vmem>>, vector<6x8xf32>
    tpu.vector_store %arg5[%c66_418, %c32_419], %226 {strides = array<i32>} : memref<96x64xf32, #tpu.memory_space<vmem>>, vector<6x8xf32>,
    %c0_420 = arith.constant 0 : index
    %c11 = arith.constant 11 : index
    %c0_421 = arith.constant 0 : index
    %c0_422 = arith.constant 0 : index
    %228 = vector.load %arg1[%c0_420, %c11, %c0_421, %c0_422] : memref<1x36x6x9xf32, #tpu.memory_space<vmem>>, vector<1x1x6x8xf32>
    %229 = vector.shape_cast %228 : vector<1x1x6x8xf32> to vector<6x8xf32>
    %c72_423 = arith.constant 72 : index
    %c32_424 = arith.constant 32 : index
    %230 = vector.load %arg5[%c72_423, %c32_424] : memref<96x64xf32, #tpu.memory_space<vmem>>, vector<6x8xf32>
    tpu.vector_store %arg5[%c72_423, %c32_424], %229 {strides = array<i32>} : memref<96x64xf32, #tpu.memory_space<vmem>>, vector<6x8xf32>,
    %c0_425 = arith.constant 0 : index
    %c29 = arith.constant 29 : index
    %c0_426 = arith.constant 0 : index
    %c0_427 = arith.constant 0 : index
    %231 = vector.load %arg1[%c0_425, %c29, %c0_426, %c0_427] : memref<1x36x6x9xf32, #tpu.memory_space<vmem>>, vector<1x1x6x8xf32>
    %232 = vector.shape_cast %231 : vector<1x1x6x8xf32> to vector<6x8xf32>
    %c78_428 = arith.constant 78 : index
    %c32_429 = arith.constant 32 : index
    %233 = vector.load %arg5[%c78_428, %c32_429] : memref<96x64xf32, #tpu.memory_space<vmem>>, vector<6x8xf32>
    tpu.vector_store %arg5[%c78_428, %c32_429], %232 {strides = array<i32>} : memref<96x64xf32, #tpu.memory_space<vmem>>, vector<6x8xf32>,
    %c0_430 = arith.constant 0 : index
    %c11_431 = arith.constant 11 : index
    %c0_432 = arith.constant 0 : index
    %c1_433 = arith.constant 1 : index
    %234 = vector.load %arg1[%c0_430, %c11_431, %c0_432, %c1_433] : memref<1x36x6x9xf32, #tpu.memory_space<vmem>>, vector<1x1x6x8xf32>
    %235 = vector.shape_cast %234 : vector<1x1x6x8xf32> to vector<6x8xf32>
    %c84_434 = arith.constant 84 : index
    %c32_435 = arith.constant 32 : index
    %236 = vector.load %arg5[%c84_434, %c32_435] : memref<96x64xf32, #tpu.memory_space<vmem>>, vector<6x8xf32>
    tpu.vector_store %arg5[%c84_434, %c32_435], %235 {strides = array<i32>} : memref<96x64xf32, #tpu.memory_space<vmem>>, vector<6x8xf32>,
    %c0_436 = arith.constant 0 : index
    %c29_437 = arith.constant 29 : index
    %c0_438 = arith.constant 0 : index
    %c1_439 = arith.constant 1 : index
    %237 = vector.load %arg1[%c0_436, %c29_437, %c0_438, %c1_439] : memref<1x36x6x9xf32, #tpu.memory_space<vmem>>, vector<1x1x6x8xf32>
    %238 = vector.shape_cast %237 : vector<1x1x6x8xf32> to vector<6x8xf32>
    %c90_440 = arith.constant 90 : index
    %c32_441 = arith.constant 32 : index
    %239 = vector.load %arg5[%c90_440, %c32_441] : memref<96x64xf32, #tpu.memory_space<vmem>>, vector<6x8xf32>
    tpu.vector_store %arg5[%c90_440, %c32_441], %238 {strides = array<i32>} : memref<96x64xf32, #tpu.memory_space<vmem>>, vector<6x8xf32>,
    %c0_442 = arith.constant 0 : index
    %c10_443 = arith.constant 10 : index
    %c0_444 = arith.constant 0 : index
    %c0_445 = arith.constant 0 : index
    %240 = vector.load %arg1[%c0_442, %c10_443, %c0_444, %c0_445] : memref<1x36x6x9xf32, #tpu.memory_space<vmem>>, vector<1x1x6x8xf32>
    %241 = vector.shape_cast %240 : vector<1x1x6x8xf32> to vector<6x8xf32>
    %c0_446 = arith.constant 0 : index
    %c40 = arith.constant 40 : index
    %242 = vector.load %arg5[%c0_446, %c40] : memref<96x64xf32, #tpu.memory_space<vmem>>, vector<6x8xf32>
    tpu.vector_store %arg5[%c0_446, %c40], %241 {strides = array<i32>} : memref<96x64xf32, #tpu.memory_space<vmem>>, vector<6x8xf32>,
    %c0_447 = arith.constant 0 : index
    %c28_448 = arith.constant 28 : index
    %c0_449 = arith.constant 0 : index
    %c0_450 = arith.constant 0 : index
    %243 = vector.load %arg1[%c0_447, %c28_448, %c0_449, %c0_450] : memref<1x36x6x9xf32, #tpu.memory_space<vmem>>, vector<1x1x6x8xf32>
    %244 = vector.shape_cast %243 : vector<1x1x6x8xf32> to vector<6x8xf32>
    %c6_451 = arith.constant 6 : index
    %c40_452 = arith.constant 40 : index
    %245 = vector.load %arg5[%c6_451, %c40_452] : memref<96x64xf32, #tpu.memory_space<vmem>>, vector<6x8xf32>
    tpu.vector_store %arg5[%c6_451, %c40_452], %244 {strides = array<i32>} : memref<96x64xf32, #tpu.memory_space<vmem>>, vector<6x8xf32>,
    %c0_453 = arith.constant 0 : index
    %c10_454 = arith.constant 10 : index
    %c0_455 = arith.constant 0 : index
    %c1_456 = arith.constant 1 : index
    %246 = vector.load %arg1[%c0_453, %c10_454, %c0_455, %c1_456] : memref<1x36x6x9xf32, #tpu.memory_space<vmem>>, vector<1x1x6x8xf32>
    %247 = vector.shape_cast %246 : vector<1x1x6x8xf32> to vector<6x8xf32>
    %c12_457 = arith.constant 12 : index
    %c40_458 = arith.constant 40 : index
    %248 = vector.load %arg5[%c12_457, %c40_458] : memref<96x64xf32, #tpu.memory_space<vmem>>, vector<6x8xf32>
    tpu.vector_store %arg5[%c12_457, %c40_458], %247 {strides = array<i32>} : memref<96x64xf32, #tpu.memory_space<vmem>>, vector<6x8xf32>,
    %c0_459 = arith.constant 0 : index
    %c28_460 = arith.constant 28 : index
    %c0_461 = arith.constant 0 : index
    %c1_462 = arith.constant 1 : index
    %249 = vector.load %arg1[%c0_459, %c28_460, %c0_461, %c1_462] : memref<1x36x6x9xf32, #tpu.memory_space<vmem>>, vector<1x1x6x8xf32>
    %250 = vector.shape_cast %249 : vector<1x1x6x8xf32> to vector<6x8xf32>
    %c18_463 = arith.constant 18 : index
    %c40_464 = arith.constant 40 : index
    %251 = vector.load %arg5[%c18_463, %c40_464] : memref<96x64xf32, #tpu.memory_space<vmem>>, vector<6x8xf32>
    tpu.vector_store %arg5[%c18_463, %c40_464], %250 {strides = array<i32>} : memref<96x64xf32, #tpu.memory_space<vmem>>, vector<6x8xf32>,
    %c0_465 = arith.constant 0 : index
    %c11_466 = arith.constant 11 : index
    %c0_467 = arith.constant 0 : index
    %c0_468 = arith.constant 0 : index
    %252 = vector.load %arg1[%c0_465, %c11_466, %c0_467, %c0_468] : memref<1x36x6x9xf32, #tpu.memory_space<vmem>>, vector<1x1x6x8xf32>
    %253 = vector.shape_cast %252 : vector<1x1x6x8xf32> to vector<6x8xf32>
    %c24_469 = arith.constant 24 : index
    %c40_470 = arith.constant 40 : index
    %254 = vector.load %arg5[%c24_469, %c40_470] : memref<96x64xf32, #tpu.memory_space<vmem>>, vector<6x8xf32>
    tpu.vector_store %arg5[%c24_469, %c40_470], %253 {strides = array<i32>} : memref<96x64xf32, #tpu.memory_space<vmem>>, vector<6x8xf32>,
    %c0_471 = arith.constant 0 : index
    %c29_472 = arith.constant 29 : index
    %c0_473 = arith.constant 0 : index
    %c0_474 = arith.constant 0 : index
    %255 = vector.load %arg1[%c0_471, %c29_472, %c0_473, %c0_474] : memref<1x36x6x9xf32, #tpu.memory_space<vmem>>, vector<1x1x6x8xf32>
    %256 = vector.shape_cast %255 : vector<1x1x6x8xf32> to vector<6x8xf32>
    %c30_475 = arith.constant 30 : index
    %c40_476 = arith.constant 40 : index
    %257 = vector.load %arg5[%c30_475, %c40_476] : memref<96x64xf32, #tpu.memory_space<vmem>>, vector<6x8xf32>
    tpu.vector_store %arg5[%c30_475, %c40_476], %256 {strides = array<i32>} : memref<96x64xf32, #tpu.memory_space<vmem>>, vector<6x8xf32>,
    %c0_477 = arith.constant 0 : index
    %c11_478 = arith.constant 11 : index
    %c0_479 = arith.constant 0 : index
    %c1_480 = arith.constant 1 : index
    %258 = vector.load %arg1[%c0_477, %c11_478, %c0_479, %c1_480] : memref<1x36x6x9xf32, #tpu.memory_space<vmem>>, vector<1x1x6x8xf32>
    %259 = vector.shape_cast %258 : vector<1x1x6x8xf32> to vector<6x8xf32>
    %c36_481 = arith.constant 36 : index
    %c40_482 = arith.constant 40 : index
    %260 = vector.load %arg5[%c36_481, %c40_482] : memref<96x64xf32, #tpu.memory_space<vmem>>, vector<6x8xf32>
    tpu.vector_store %arg5[%c36_481, %c40_482], %259 {strides = array<i32>} : memref<96x64xf32, #tpu.memory_space<vmem>>, vector<6x8xf32>,
    %c0_483 = arith.constant 0 : index
    %c29_484 = arith.constant 29 : index
    %c0_485 = arith.constant 0 : index
    %c1_486 = arith.constant 1 : index
    %261 = vector.load %arg1[%c0_483, %c29_484, %c0_485, %c1_486] : memref<1x36x6x9xf32, #tpu.memory_space<vmem>>, vector<1x1x6x8xf32>
    %262 = vector.shape_cast %261 : vector<1x1x6x8xf32> to vector<6x8xf32>
    %c42_487 = arith.constant 42 : index
    %c40_488 = arith.constant 40 : index
    %263 = vector.load %arg5[%c42_487, %c40_488] : memref<96x64xf32, #tpu.memory_space<vmem>>, vector<6x8xf32>
    tpu.vector_store %arg5[%c42_487, %c40_488], %262 {strides = array<i32>} : memref<96x64xf32, #tpu.memory_space<vmem>>, vector<6x8xf32>,
    %c0_489 = arith.constant 0 : index
    %c12_490 = arith.constant 12 : index
    %c0_491 = arith.constant 0 : index
    %c0_492 = arith.constant 0 : index
    %264 = vector.load %arg1[%c0_489, %c12_490, %c0_491, %c0_492] : memref<1x36x6x9xf32, #tpu.memory_space<vmem>>, vector<1x1x6x8xf32>
    %265 = vector.shape_cast %264 : vector<1x1x6x8xf32> to vector<6x8xf32>
    %c48_493 = arith.constant 48 : index
    %c40_494 = arith.constant 40 : index
    %266 = vector.load %arg5[%c48_493, %c40_494] : memref<96x64xf32, #tpu.memory_space<vmem>>, vector<6x8xf32>
    tpu.vector_store %arg5[%c48_493, %c40_494], %265 {strides = array<i32>} : memref<96x64xf32, #tpu.memory_space<vmem>>, vector<6x8xf32>,
    %c0_495 = arith.constant 0 : index
    %c30_496 = arith.constant 30 : index
    %c0_497 = arith.constant 0 : index
    %c0_498 = arith.constant 0 : index
    %267 = vector.load %arg1[%c0_495, %c30_496, %c0_497, %c0_498] : memref<1x36x6x9xf32, #tpu.memory_space<vmem>>, vector<1x1x6x8xf32>
    %268 = vector.shape_cast %267 : vector<1x1x6x8xf32> to vector<6x8xf32>
    %c54_499 = arith.constant 54 : index
    %c40_500 = arith.constant 40 : index
    %269 = vector.load %arg5[%c54_499, %c40_500] : memref<96x64xf32, #tpu.memory_space<vmem>>, vector<6x8xf32>
    tpu.vector_store %arg5[%c54_499, %c40_500], %268 {strides = array<i32>} : memref<96x64xf32, #tpu.memory_space<vmem>>, vector<6x8xf32>,
    %c0_501 = arith.constant 0 : index
    %c12_502 = arith.constant 12 : index
    %c0_503 = arith.constant 0 : index
    %c1_504 = arith.constant 1 : index
    %270 = vector.load %arg1[%c0_501, %c12_502, %c0_503, %c1_504] : memref<1x36x6x9xf32, #tpu.memory_space<vmem>>, vector<1x1x6x8xf32>
    %271 = vector.shape_cast %270 : vector<1x1x6x8xf32> to vector<6x8xf32>
    %c60_505 = arith.constant 60 : index
    %c40_506 = arith.constant 40 : index
    %272 = vector.load %arg5[%c60_505, %c40_506] : memref<96x64xf32, #tpu.memory_space<vmem>>, vector<6x8xf32>
    tpu.vector_store %arg5[%c60_505, %c40_506], %271 {strides = array<i32>} : memref<96x64xf32, #tpu.memory_space<vmem>>, vector<6x8xf32>,
    %c0_507 = arith.constant 0 : index
    %c30_508 = arith.constant 30 : index
    %c0_509 = arith.constant 0 : index
    %c1_510 = arith.constant 1 : index
    %273 = vector.load %arg1[%c0_507, %c30_508, %c0_509, %c1_510] : memref<1x36x6x9xf32, #tpu.memory_space<vmem>>, vector<1x1x6x8xf32>
    %274 = vector.shape_cast %273 : vector<1x1x6x8xf32> to vector<6x8xf32>
    %c66_511 = arith.constant 66 : index
    %c40_512 = arith.constant 40 : index
    %275 = vector.load %arg5[%c66_511, %c40_512] : memref<96x64xf32, #tpu.memory_space<vmem>>, vector<6x8xf32>
    tpu.vector_store %arg5[%c66_511, %c40_512], %274 {strides = array<i32>} : memref<96x64xf32, #tpu.memory_space<vmem>>, vector<6x8xf32>,
    %c0_513 = arith.constant 0 : index
    %c13 = arith.constant 13 : index
    %c0_514 = arith.constant 0 : index
    %c0_515 = arith.constant 0 : index
    %276 = vector.load %arg1[%c0_513, %c13, %c0_514, %c0_515] : memref<1x36x6x9xf32, #tpu.memory_space<vmem>>, vector<1x1x6x8xf32>
    %277 = vector.shape_cast %276 : vector<1x1x6x8xf32> to vector<6x8xf32>
    %c72_516 = arith.constant 72 : index
    %c40_517 = arith.constant 40 : index
    %278 = vector.load %arg5[%c72_516, %c40_517] : memref<96x64xf32, #tpu.memory_space<vmem>>, vector<6x8xf32>
    tpu.vector_store %arg5[%c72_516, %c40_517], %277 {strides = array<i32>} : memref<96x64xf32, #tpu.memory_space<vmem>>, vector<6x8xf32>,
    %c0_518 = arith.constant 0 : index
    %c31 = arith.constant 31 : index
    %c0_519 = arith.constant 0 : index
    %c0_520 = arith.constant 0 : index
    %279 = vector.load %arg1[%c0_518, %c31, %c0_519, %c0_520] : memref<1x36x6x9xf32, #tpu.memory_space<vmem>>, vector<1x1x6x8xf32>
    %280 = vector.shape_cast %279 : vector<1x1x6x8xf32> to vector<6x8xf32>
    %c78_521 = arith.constant 78 : index
    %c40_522 = arith.constant 40 : index
    %281 = vector.load %arg5[%c78_521, %c40_522] : memref<96x64xf32, #tpu.memory_space<vmem>>, vector<6x8xf32>
    tpu.vector_store %arg5[%c78_521, %c40_522], %280 {strides = array<i32>} : memref<96x64xf32, #tpu.memory_space<vmem>>, vector<6x8xf32>,
    %c0_523 = arith.constant 0 : index
    %c13_524 = arith.constant 13 : index
    %c0_525 = arith.constant 0 : index
    %c1_526 = arith.constant 1 : index
    %282 = vector.load %arg1[%c0_523, %c13_524, %c0_525, %c1_526] : memref<1x36x6x9xf32, #tpu.memory_space<vmem>>, vector<1x1x6x8xf32>
    %283 = vector.shape_cast %282 : vector<1x1x6x8xf32> to vector<6x8xf32>
    %c84_527 = arith.constant 84 : index
    %c40_528 = arith.constant 40 : index
    %284 = vector.load %arg5[%c84_527, %c40_528] : memref<96x64xf32, #tpu.memory_space<vmem>>, vector<6x8xf32>
    tpu.vector_store %arg5[%c84_527, %c40_528], %283 {strides = array<i32>} : memref<96x64xf32, #tpu.memory_space<vmem>>, vector<6x8xf32>,
    %c0_529 = arith.constant 0 : index
    %c31_530 = arith.constant 31 : index
    %c0_531 = arith.constant 0 : index
    %c1_532 = arith.constant 1 : index
    %285 = vector.load %arg1[%c0_529, %c31_530, %c0_531, %c1_532] : memref<1x36x6x9xf32, #tpu.memory_space<vmem>>, vector<1x1x6x8xf32>
    %286 = vector.shape_cast %285 : vector<1x1x6x8xf32> to vector<6x8xf32>
    %c90_533 = arith.constant 90 : index
    %c40_534 = arith.constant 40 : index
    %287 = vector.load %arg5[%c90_533, %c40_534] : memref<96x64xf32, #tpu.memory_space<vmem>>, vector<6x8xf32>
    tpu.vector_store %arg5[%c90_533, %c40_534], %286 {strides = array<i32>} : memref<96x64xf32, #tpu.memory_space<vmem>>, vector<6x8xf32>,
    %c0_535 = arith.constant 0 : index
    %c12_536 = arith.constant 12 : index
    %c0_537 = arith.constant 0 : index
    %c0_538 = arith.constant 0 : index
    %288 = vector.load %arg1[%c0_535, %c12_536, %c0_537, %c0_538] : memref<1x36x6x9xf32, #tpu.memory_space<vmem>>, vector<1x1x6x8xf32>
    %289 = vector.shape_cast %288 : vector<1x1x6x8xf32> to vector<6x8xf32>
    %c0_539 = arith.constant 0 : index
    %c48_540 = arith.constant 48 : index
    %290 = vector.load %arg5[%c0_539, %c48_540] : memref<96x64xf32, #tpu.memory_space<vmem>>, vector<6x8xf32>
    tpu.vector_store %arg5[%c0_539, %c48_540], %289 {strides = array<i32>} : memref<96x64xf32, #tpu.memory_space<vmem>>, vector<6x8xf32>,
    %c0_541 = arith.constant 0 : index
    %c30_542 = arith.constant 30 : index
    %c0_543 = arith.constant 0 : index
    %c0_544 = arith.constant 0 : index
    %291 = vector.load %arg1[%c0_541, %c30_542, %c0_543, %c0_544] : memref<1x36x6x9xf32, #tpu.memory_space<vmem>>, vector<1x1x6x8xf32>
    %292 = vector.shape_cast %291 : vector<1x1x6x8xf32> to vector<6x8xf32>
    %c6_545 = arith.constant 6 : index
    %c48_546 = arith.constant 48 : index
    %293 = vector.load %arg5[%c6_545, %c48_546] : memref<96x64xf32, #tpu.memory_space<vmem>>, vector<6x8xf32>
    tpu.vector_store %arg5[%c6_545, %c48_546], %292 {strides = array<i32>} : memref<96x64xf32, #tpu.memory_space<vmem>>, vector<6x8xf32>,
    %c0_547 = arith.constant 0 : index
    %c12_548 = arith.constant 12 : index
    %c0_549 = arith.constant 0 : index
    %c1_550 = arith.constant 1 : index
    %294 = vector.load %arg1[%c0_547, %c12_548, %c0_549, %c1_550] : memref<1x36x6x9xf32, #tpu.memory_space<vmem>>, vector<1x1x6x8xf32>
    %295 = vector.shape_cast %294 : vector<1x1x6x8xf32> to vector<6x8xf32>
    %c12_551 = arith.constant 12 : index
    %c48_552 = arith.constant 48 : index
    %296 = vector.load %arg5[%c12_551, %c48_552] : memref<96x64xf32, #tpu.memory_space<vmem>>, vector<6x8xf32>
    tpu.vector_store %arg5[%c12_551, %c48_552], %295 {strides = array<i32>} : memref<96x64xf32, #tpu.memory_space<vmem>>, vector<6x8xf32>,
    %c0_553 = arith.constant 0 : index
    %c30_554 = arith.constant 30 : index
    %c0_555 = arith.constant 0 : index
    %c1_556 = arith.constant 1 : index
    %297 = vector.load %arg1[%c0_553, %c30_554, %c0_555, %c1_556] : memref<1x36x6x9xf32, #tpu.memory_space<vmem>>, vector<1x1x6x8xf32>
    %298 = vector.shape_cast %297 : vector<1x1x6x8xf32> to vector<6x8xf32>
    %c18_557 = arith.constant 18 : index
    %c48_558 = arith.constant 48 : index
    %299 = vector.load %arg5[%c18_557, %c48_558] : memref<96x64xf32, #tpu.memory_space<vmem>>, vector<6x8xf32>
    tpu.vector_store %arg5[%c18_557, %c48_558], %298 {strides = array<i32>} : memref<96x64xf32, #tpu.memory_space<vmem>>, vector<6x8xf32>,
    %c0_559 = arith.constant 0 : index
    %c13_560 = arith.constant 13 : index
    %c0_561 = arith.constant 0 : index
    %c0_562 = arith.constant 0 : index
    %300 = vector.load %arg1[%c0_559, %c13_560, %c0_561, %c0_562] : memref<1x36x6x9xf32, #tpu.memory_space<vmem>>, vector<1x1x6x8xf32>
    %301 = vector.shape_cast %300 : vector<1x1x6x8xf32> to vector<6x8xf32>
    %c24_563 = arith.constant 24 : index
    %c48_564 = arith.constant 48 : index
    %302 = vector.load %arg5[%c24_563, %c48_564] : memref<96x64xf32, #tpu.memory_space<vmem>>, vector<6x8xf32>
    tpu.vector_store %arg5[%c24_563, %c48_564], %301 {strides = array<i32>} : memref<96x64xf32, #tpu.memory_space<vmem>>, vector<6x8xf32>,
    %c0_565 = arith.constant 0 : index
    %c31_566 = arith.constant 31 : index
    %c0_567 = arith.constant 0 : index
    %c0_568 = arith.constant 0 : index
    %303 = vector.load %arg1[%c0_565, %c31_566, %c0_567, %c0_568] : memref<1x36x6x9xf32, #tpu.memory_space<vmem>>, vector<1x1x6x8xf32>
    %304 = vector.shape_cast %303 : vector<1x1x6x8xf32> to vector<6x8xf32>
    %c30_569 = arith.constant 30 : index
    %c48_570 = arith.constant 48 : index
    %305 = vector.load %arg5[%c30_569, %c48_570] : memref<96x64xf32, #tpu.memory_space<vmem>>, vector<6x8xf32>
    tpu.vector_store %arg5[%c30_569, %c48_570], %304 {strides = array<i32>} : memref<96x64xf32, #tpu.memory_space<vmem>>, vector<6x8xf32>,
    %c0_571 = arith.constant 0 : index
    %c13_572 = arith.constant 13 : index
    %c0_573 = arith.constant 0 : index
    %c1_574 = arith.constant 1 : index
    %306 = vector.load %arg1[%c0_571, %c13_572, %c0_573, %c1_574] : memref<1x36x6x9xf32, #tpu.memory_space<vmem>>, vector<1x1x6x8xf32>
    %307 = vector.shape_cast %306 : vector<1x1x6x8xf32> to vector<6x8xf32>
    %c36_575 = arith.constant 36 : index
    %c48_576 = arith.constant 48 : index
    %308 = vector.load %arg5[%c36_575, %c48_576] : memref<96x64xf32, #tpu.memory_space<vmem>>, vector<6x8xf32>
    tpu.vector_store %arg5[%c36_575, %c48_576], %307 {strides = array<i32>} : memref<96x64xf32, #tpu.memory_space<vmem>>, vector<6x8xf32>,
    %c0_577 = arith.constant 0 : index
    %c31_578 = arith.constant 31 : index
    %c0_579 = arith.constant 0 : index
    %c1_580 = arith.constant 1 : index
    %309 = vector.load %arg1[%c0_577, %c31_578, %c0_579, %c1_580] : memref<1x36x6x9xf32, #tpu.memory_space<vmem>>, vector<1x1x6x8xf32>
    %310 = vector.shape_cast %309 : vector<1x1x6x8xf32> to vector<6x8xf32>
    %c42_581 = arith.constant 42 : index
    %c48_582 = arith.constant 48 : index
    %311 = vector.load %arg5[%c42_581, %c48_582] : memref<96x64xf32, #tpu.memory_space<vmem>>, vector<6x8xf32>
    tpu.vector_store %arg5[%c42_581, %c48_582], %310 {strides = array<i32>} : memref<96x64xf32, #tpu.memory_space<vmem>>, vector<6x8xf32>,
    %c0_583 = arith.constant 0 : index
    %c14 = arith.constant 14 : index
    %c0_584 = arith.constant 0 : index
    %c0_585 = arith.constant 0 : index
    %312 = vector.load %arg1[%c0_583, %c14, %c0_584, %c0_585] : memref<1x36x6x9xf32, #tpu.memory_space<vmem>>, vector<1x1x6x8xf32>
    %313 = vector.shape_cast %312 : vector<1x1x6x8xf32> to vector<6x8xf32>
    %c48_586 = arith.constant 48 : index
    %c48_587 = arith.constant 48 : index
    %314 = vector.load %arg5[%c48_586, %c48_587] : memref<96x64xf32, #tpu.memory_space<vmem>>, vector<6x8xf32>
    tpu.vector_store %arg5[%c48_586, %c48_587], %313 {strides = array<i32>} : memref<96x64xf32, #tpu.memory_space<vmem>>, vector<6x8xf32>,
    %c0_588 = arith.constant 0 : index
    %c32_589 = arith.constant 32 : index
    %c0_590 = arith.constant 0 : index
    %c0_591 = arith.constant 0 : index
    %315 = vector.load %arg1[%c0_588, %c32_589, %c0_590, %c0_591] : memref<1x36x6x9xf32, #tpu.memory_space<vmem>>, vector<1x1x6x8xf32>
    %316 = vector.shape_cast %315 : vector<1x1x6x8xf32> to vector<6x8xf32>
    %c54_592 = arith.constant 54 : index
    %c48_593 = arith.constant 48 : index
    %317 = vector.load %arg5[%c54_592, %c48_593] : memref<96x64xf32, #tpu.memory_space<vmem>>, vector<6x8xf32>
    tpu.vector_store %arg5[%c54_592, %c48_593], %316 {strides = array<i32>} : memref<96x64xf32, #tpu.memory_space<vmem>>, vector<6x8xf32>,
    %c0_594 = arith.constant 0 : index
    %c14_595 = arith.constant 14 : index
    %c0_596 = arith.constant 0 : index
    %c1_597 = arith.constant 1 : index
    %318 = vector.load %arg1[%c0_594, %c14_595, %c0_596, %c1_597] : memref<1x36x6x9xf32, #tpu.memory_space<vmem>>, vector<1x1x6x8xf32>
    %319 = vector.shape_cast %318 : vector<1x1x6x8xf32> to vector<6x8xf32>
    %c60_598 = arith.constant 60 : index
    %c48_599 = arith.constant 48 : index
    %320 = vector.load %arg5[%c60_598, %c48_599] : memref<96x64xf32, #tpu.memory_space<vmem>>, vector<6x8xf32>
    tpu.vector_store %arg5[%c60_598, %c48_599], %319 {strides = array<i32>} : memref<96x64xf32, #tpu.memory_space<vmem>>, vector<6x8xf32>,
    %c0_600 = arith.constant 0 : index
    %c32_601 = arith.constant 32 : index
    %c0_602 = arith.constant 0 : index
    %c1_603 = arith.constant 1 : index
    %321 = vector.load %arg1[%c0_600, %c32_601, %c0_602, %c1_603] : memref<1x36x6x9xf32, #tpu.memory_space<vmem>>, vector<1x1x6x8xf32>
    %322 = vector.shape_cast %321 : vector<1x1x6x8xf32> to vector<6x8xf32>
    %c66_604 = arith.constant 66 : index
    %c48_605 = arith.constant 48 : index
    %323 = vector.load %arg5[%c66_604, %c48_605] : memref<96x64xf32, #tpu.memory_space<vmem>>, vector<6x8xf32>
    tpu.vector_store %arg5[%c66_604, %c48_605], %322 {strides = array<i32>} : memref<96x64xf32, #tpu.memory_space<vmem>>, vector<6x8xf32>,
    %c0_606 = arith.constant 0 : index
    %c15 = arith.constant 15 : index
    %c0_607 = arith.constant 0 : index
    %c0_608 = arith.constant 0 : index
    %324 = vector.load %arg1[%c0_606, %c15, %c0_607, %c0_608] : memref<1x36x6x9xf32, #tpu.memory_space<vmem>>, vector<1x1x6x8xf32>
    %325 = vector.shape_cast %324 : vector<1x1x6x8xf32> to vector<6x8xf32>
    %c72_609 = arith.constant 72 : index
    %c48_610 = arith.constant 48 : index
    %326 = vector.load %arg5[%c72_609, %c48_610] : memref<96x64xf32, #tpu.memory_space<vmem>>, vector<6x8xf32>
    tpu.vector_store %arg5[%c72_609, %c48_610], %325 {strides = array<i32>} : memref<96x64xf32, #tpu.memory_space<vmem>>, vector<6x8xf32>,
    %c0_611 = arith.constant 0 : index
    %c33 = arith.constant 33 : index
    %c0_612 = arith.constant 0 : index
    %c0_613 = arith.constant 0 : index
    %327 = vector.load %arg1[%c0_611, %c33, %c0_612, %c0_613] : memref<1x36x6x9xf32, #tpu.memory_space<vmem>>, vector<1x1x6x8xf32>
    %328 = vector.shape_cast %327 : vector<1x1x6x8xf32> to vector<6x8xf32>
    %c78_614 = arith.constant 78 : index
    %c48_615 = arith.constant 48 : index
    %329 = vector.load %arg5[%c78_614, %c48_615] : memref<96x64xf32, #tpu.memory_space<vmem>>, vector<6x8xf32>
    tpu.vector_store %arg5[%c78_614, %c48_615], %328 {strides = array<i32>} : memref<96x64xf32, #tpu.memory_space<vmem>>, vector<6x8xf32>,
    %c0_616 = arith.constant 0 : index
    %c15_617 = arith.constant 15 : index
    %c0_618 = arith.constant 0 : index
    %c1_619 = arith.constant 1 : index
    %330 = vector.load %arg1[%c0_616, %c15_617, %c0_618, %c1_619] : memref<1x36x6x9xf32, #tpu.memory_space<vmem>>, vector<1x1x6x8xf32>
    %331 = vector.shape_cast %330 : vector<1x1x6x8xf32> to vector<6x8xf32>
    %c84_620 = arith.constant 84 : index
    %c48_621 = arith.constant 48 : index
    %332 = vector.load %arg5[%c84_620, %c48_621] : memref<96x64xf32, #tpu.memory_space<vmem>>, vector<6x8xf32>
    tpu.vector_store %arg5[%c84_620, %c48_621], %331 {strides = array<i32>} : memref<96x64xf32, #tpu.memory_space<vmem>>, vector<6x8xf32>,
    %c0_622 = arith.constant 0 : index
    %c33_623 = arith.constant 33 : index
    %c0_624 = arith.constant 0 : index
    %c1_625 = arith.constant 1 : index
    %333 = vector.load %arg1[%c0_622, %c33_623, %c0_624, %c1_625] : memref<1x36x6x9xf32, #tpu.memory_space<vmem>>, vector<1x1x6x8xf32>
    %334 = vector.shape_cast %333 : vector<1x1x6x8xf32> to vector<6x8xf32>
    %c90_626 = arith.constant 90 : index
    %c48_627 = arith.constant 48 : index
    %335 = vector.load %arg5[%c90_626, %c48_627] : memref<96x64xf32, #tpu.memory_space<vmem>>, vector<6x8xf32>
    tpu.vector_store %arg5[%c90_626, %c48_627], %334 {strides = array<i32>} : memref<96x64xf32, #tpu.memory_space<vmem>>, vector<6x8xf32>,
    %c0_628 = arith.constant 0 : index
    %c14_629 = arith.constant 14 : index
    %c0_630 = arith.constant 0 : index
    %c0_631 = arith.constant 0 : index
    %336 = vector.load %arg1[%c0_628, %c14_629, %c0_630, %c0_631] : memref<1x36x6x9xf32, #tpu.memory_space<vmem>>, vector<1x1x6x8xf32>
    %337 = vector.shape_cast %336 : vector<1x1x6x8xf32> to vector<6x8xf32>
    %c0_632 = arith.constant 0 : index
    %c56 = arith.constant 56 : index
    %338 = vector.load %arg5[%c0_632, %c56] : memref<96x64xf32, #tpu.memory_space<vmem>>, vector<6x8xf32>
    tpu.vector_store %arg5[%c0_632, %c56], %337 {strides = array<i32>} : memref<96x64xf32, #tpu.memory_space<vmem>>, vector<6x8xf32>,
    %c0_633 = arith.constant 0 : index
    %c32_634 = arith.constant 32 : index
    %c0_635 = arith.constant 0 : index
    %c0_636 = arith.constant 0 : index
    %339 = vector.load %arg1[%c0_633, %c32_634, %c0_635, %c0_636] : memref<1x36x6x9xf32, #tpu.memory_space<vmem>>, vector<1x1x6x8xf32>
    %340 = vector.shape_cast %339 : vector<1x1x6x8xf32> to vector<6x8xf32>
    %c6_637 = arith.constant 6 : index
    %c56_638 = arith.constant 56 : index
    %341 = vector.load %arg5[%c6_637, %c56_638] : memref<96x64xf32, #tpu.memory_space<vmem>>, vector<6x8xf32>
    tpu.vector_store %arg5[%c6_637, %c56_638], %340 {strides = array<i32>} : memref<96x64xf32, #tpu.memory_space<vmem>>, vector<6x8xf32>,
    %c0_639 = arith.constant 0 : index
    %c14_640 = arith.constant 14 : index
    %c0_641 = arith.constant 0 : index
    %c1_642 = arith.constant 1 : index
    %342 = vector.load %arg1[%c0_639, %c14_640, %c0_641, %c1_642] : memref<1x36x6x9xf32, #tpu.memory_space<vmem>>, vector<1x1x6x8xf32>
    %343 = vector.shape_cast %342 : vector<1x1x6x8xf32> to vector<6x8xf32>
    %c12_643 = arith.constant 12 : index
    %c56_644 = arith.constant 56 : index
    %344 = vector.load %arg5[%c12_643, %c56_644] : memref<96x64xf32, #tpu.memory_space<vmem>>, vector<6x8xf32>
    tpu.vector_store %arg5[%c12_643, %c56_644], %343 {strides = array<i32>} : memref<96x64xf32, #tpu.memory_space<vmem>>, vector<6x8xf32>,
    %c0_645 = arith.constant 0 : index
    %c32_646 = arith.constant 32 : index
    %c0_647 = arith.constant 0 : index
    %c1_648 = arith.constant 1 : index
    %345 = vector.load %arg1[%c0_645, %c32_646, %c0_647, %c1_648] : memref<1x36x6x9xf32, #tpu.memory_space<vmem>>, vector<1x1x6x8xf32>
    %346 = vector.shape_cast %345 : vector<1x1x6x8xf32> to vector<6x8xf32>
    %c18_649 = arith.constant 18 : index
    %c56_650 = arith.constant 56 : index
    %347 = vector.load %arg5[%c18_649, %c56_650] : memref<96x64xf32, #tpu.memory_space<vmem>>, vector<6x8xf32>
    tpu.vector_store %arg5[%c18_649, %c56_650], %346 {strides = array<i32>} : memref<96x64xf32, #tpu.memory_space<vmem>>, vector<6x8xf32>,
    %c0_651 = arith.constant 0 : index
    %c15_652 = arith.constant 15 : index
    %c0_653 = arith.constant 0 : index
    %c0_654 = arith.constant 0 : index
    %348 = vector.load %arg1[%c0_651, %c15_652, %c0_653, %c0_654] : memref<1x36x6x9xf32, #tpu.memory_space<vmem>>, vector<1x1x6x8xf32>
    %349 = vector.shape_cast %348 : vector<1x1x6x8xf32> to vector<6x8xf32>
    %c24_655 = arith.constant 24 : index
    %c56_656 = arith.constant 56 : index
    %350 = vector.load %arg5[%c24_655, %c56_656] : memref<96x64xf32, #tpu.memory_space<vmem>>, vector<6x8xf32>
    tpu.vector_store %arg5[%c24_655, %c56_656], %349 {strides = array<i32>} : memref<96x64xf32, #tpu.memory_space<vmem>>, vector<6x8xf32>,
    %c0_657 = arith.constant 0 : index
    %c33_658 = arith.constant 33 : index
    %c0_659 = arith.constant 0 : index
    %c0_660 = arith.constant 0 : index
    %351 = vector.load %arg1[%c0_657, %c33_658, %c0_659, %c0_660] : memref<1x36x6x9xf32, #tpu.memory_space<vmem>>, vector<1x1x6x8xf32>
    %352 = vector.shape_cast %351 : vector<1x1x6x8xf32> to vector<6x8xf32>
    %c30_661 = arith.constant 30 : index
    %c56_662 = arith.constant 56 : index
    %353 = vector.load %arg5[%c30_661, %c56_662] : memref<96x64xf32, #tpu.memory_space<vmem>>, vector<6x8xf32>
    tpu.vector_store %arg5[%c30_661, %c56_662], %352 {strides = array<i32>} : memref<96x64xf32, #tpu.memory_space<vmem>>, vector<6x8xf32>,
    %c0_663 = arith.constant 0 : index
    %c15_664 = arith.constant 15 : index
    %c0_665 = arith.constant 0 : index
    %c1_666 = arith.constant 1 : index
    %354 = vector.load %arg1[%c0_663, %c15_664, %c0_665, %c1_666] : memref<1x36x6x9xf32, #tpu.memory_space<vmem>>, vector<1x1x6x8xf32>
    %355 = vector.shape_cast %354 : vector<1x1x6x8xf32> to vector<6x8xf32>
    %c36_667 = arith.constant 36 : index
    %c56_668 = arith.constant 56 : index
    %356 = vector.load %arg5[%c36_667, %c56_668] : memref<96x64xf32, #tpu.memory_space<vmem>>, vector<6x8xf32>
    tpu.vector_store %arg5[%c36_667, %c56_668], %355 {strides = array<i32>} : memref<96x64xf32, #tpu.memory_space<vmem>>, vector<6x8xf32>,
    %c0_669 = arith.constant 0 : index
    %c33_670 = arith.constant 33 : index
    %c0_671 = arith.constant 0 : index
    %c1_672 = arith.constant 1 : index
    %357 = vector.load %arg1[%c0_669, %c33_670, %c0_671, %c1_672] : memref<1x36x6x9xf32, #tpu.memory_space<vmem>>, vector<1x1x6x8xf32>
    %358 = vector.shape_cast %357 : vector<1x1x6x8xf32> to vector<6x8xf32>
    %c42_673 = arith.constant 42 : index
    %c56_674 = arith.constant 56 : index
    %359 = vector.load %arg5[%c42_673, %c56_674] : memref<96x64xf32, #tpu.memory_space<vmem>>, vector<6x8xf32>
    tpu.vector_store %arg5[%c42_673, %c56_674], %358 {strides = array<i32>} : memref<96x64xf32, #tpu.memory_space<vmem>>, vector<6x8xf32>,
    %c0_675 = arith.constant 0 : index
    %c16_676 = arith.constant 16 : index
    %c0_677 = arith.constant 0 : index
    %c0_678 = arith.constant 0 : index
    %360 = vector.load %arg1[%c0_675, %c16_676, %c0_677, %c0_678] : memref<1x36x6x9xf32, #tpu.memory_space<vmem>>, vector<1x1x6x8xf32>
    %361 = vector.shape_cast %360 : vector<1x1x6x8xf32> to vector<6x8xf32>
    %c48_679 = arith.constant 48 : index
    %c56_680 = arith.constant 56 : index
    %362 = vector.load %arg5[%c48_679, %c56_680] : memref<96x64xf32, #tpu.memory_space<vmem>>, vector<6x8xf32>
    tpu.vector_store %arg5[%c48_679, %c56_680], %361 {strides = array<i32>} : memref<96x64xf32, #tpu.memory_space<vmem>>, vector<6x8xf32>,
    %c0_681 = arith.constant 0 : index
    %c34 = arith.constant 34 : index
    %c0_682 = arith.constant 0 : index
    %c0_683 = arith.constant 0 : index
    %363 = vector.load %arg1[%c0_681, %c34, %c0_682, %c0_683] : memref<1x36x6x9xf32, #tpu.memory_space<vmem>>, vector<1x1x6x8xf32>
    %364 = vector.shape_cast %363 : vector<1x1x6x8xf32> to vector<6x8xf32>
    %c54_684 = arith.constant 54 : index
    %c56_685 = arith.constant 56 : index
    %365 = vector.load %arg5[%c54_684, %c56_685] : memref<96x64xf32, #tpu.memory_space<vmem>>, vector<6x8xf32>
    tpu.vector_store %arg5[%c54_684, %c56_685], %364 {strides = array<i32>} : memref<96x64xf32, #tpu.memory_space<vmem>>, vector<6x8xf32>,
    %c0_686 = arith.constant 0 : index
    %c16_687 = arith.constant 16 : index
    %c0_688 = arith.constant 0 : index
    %c1_689 = arith.constant 1 : index
    %366 = vector.load %arg1[%c0_686, %c16_687, %c0_688, %c1_689] : memref<1x36x6x9xf32, #tpu.memory_space<vmem>>, vector<1x1x6x8xf32>
    %367 = vector.shape_cast %366 : vector<1x1x6x8xf32> to vector<6x8xf32>
    %c60_690 = arith.constant 60 : index
    %c56_691 = arith.constant 56 : index
    %368 = vector.load %arg5[%c60_690, %c56_691] : memref<96x64xf32, #tpu.memory_space<vmem>>, vector<6x8xf32>
    tpu.vector_store %arg5[%c60_690, %c56_691], %367 {strides = array<i32>} : memref<96x64xf32, #tpu.memory_space<vmem>>, vector<6x8xf32>,
    %c0_692 = arith.constant 0 : index
    %c34_693 = arith.constant 34 : index
    %c0_694 = arith.constant 0 : index
    %c1_695 = arith.constant 1 : index
    %369 = vector.load %arg1[%c0_692, %c34_693, %c0_694, %c1_695] : memref<1x36x6x9xf32, #tpu.memory_space<vmem>>, vector<1x1x6x8xf32>
    %370 = vector.shape_cast %369 : vector<1x1x6x8xf32> to vector<6x8xf32>
    %c66_696 = arith.constant 66 : index
    %c56_697 = arith.constant 56 : index
    %371 = vector.load %arg5[%c66_696, %c56_697] : memref<96x64xf32, #tpu.memory_space<vmem>>, vector<6x8xf32>
    tpu.vector_store %arg5[%c66_696, %c56_697], %370 {strides = array<i32>} : memref<96x64xf32, #tpu.memory_space<vmem>>, vector<6x8xf32>,
    %c0_698 = arith.constant 0 : index
    %c17 = arith.constant 17 : index
    %c0_699 = arith.constant 0 : index
    %c0_700 = arith.constant 0 : index
    %372 = vector.load %arg1[%c0_698, %c17, %c0_699, %c0_700] : memref<1x36x6x9xf32, #tpu.memory_space<vmem>>, vector<1x1x6x8xf32>
    %373 = vector.shape_cast %372 : vector<1x1x6x8xf32> to vector<6x8xf32>
    %c72_701 = arith.constant 72 : index
    %c56_702 = arith.constant 56 : index
    %374 = vector.load %arg5[%c72_701, %c56_702] : memref<96x64xf32, #tpu.memory_space<vmem>>, vector<6x8xf32>
    tpu.vector_store %arg5[%c72_701, %c56_702], %373 {strides = array<i32>} : memref<96x64xf32, #tpu.memory_space<vmem>>, vector<6x8xf32>,
    %c0_703 = arith.constant 0 : index
    %c35 = arith.constant 35 : index
    %c0_704 = arith.constant 0 : index
    %c0_705 = arith.constant 0 : index
    %375 = vector.load %arg1[%c0_703, %c35, %c0_704, %c0_705] : memref<1x36x6x9xf32, #tpu.memory_space<vmem>>, vector<1x1x6x8xf32>
    %376 = vector.shape_cast %375 : vector<1x1x6x8xf32> to vector<6x8xf32>
    %c78_706 = arith.constant 78 : index
    %c56_707 = arith.constant 56 : index
    %377 = vector.load %arg5[%c78_706, %c56_707] : memref<96x64xf32, #tpu.memory_space<vmem>>, vector<6x8xf32>
    tpu.vector_store %arg5[%c78_706, %c56_707], %376 {strides = array<i32>} : memref<96x64xf32, #tpu.memory_space<vmem>>, vector<6x8xf32>,
    %c0_708 = arith.constant 0 : index
    %c17_709 = arith.constant 17 : index
    %c0_710 = arith.constant 0 : index
    %c1_711 = arith.constant 1 : index
    %378 = vector.load %arg1[%c0_708, %c17_709, %c0_710, %c1_711] : memref<1x36x6x9xf32, #tpu.memory_space<vmem>>, vector<1x1x6x8xf32>
    %379 = vector.shape_cast %378 : vector<1x1x6x8xf32> to vector<6x8xf32>
    %c84_712 = arith.constant 84 : index
    %c56_713 = arith.constant 56 : index
    %380 = vector.load %arg5[%c84_712, %c56_713] : memref<96x64xf32, #tpu.memory_space<vmem>>, vector<6x8xf32>
    tpu.vector_store %arg5[%c84_712, %c56_713], %379 {strides = array<i32>} : memref<96x64xf32, #tpu.memory_space<vmem>>, vector<6x8xf32>,
    %c0_714 = arith.constant 0 : index
    %c35_715 = arith.constant 35 : index
    %c0_716 = arith.constant 0 : index
    %c1_717 = arith.constant 1 : index
    %381 = vector.load %arg1[%c0_714, %c35_715, %c0_716, %c1_717] : memref<1x36x6x9xf32, #tpu.memory_space<vmem>>, vector<1x1x6x8xf32>
    %382 = vector.shape_cast %381 : vector<1x1x6x8xf32> to vector<6x8xf32>
    %c90_718 = arith.constant 90 : index
    %c56_719 = arith.constant 56 : index
    %383 = vector.load %arg5[%c90_718, %c56_719] : memref<96x64xf32, #tpu.memory_space<vmem>>, vector<6x8xf32>
    tpu.vector_store %arg5[%c90_718, %c56_719], %382 {strides = array<i32>} : memref<96x64xf32, #tpu.memory_space<vmem>>, vector<6x8xf32>,
    %c0_720 = arith.constant 0 : index
    %c0_721 = arith.constant 0 : index
    %384 = vector.load %arg2[%c0_720, %c0_721] : memref<8x96xf32, #tpu.memory_space<vmem>>, vector<8x96xf32>
    %c0_722 = arith.constant 0 : index
    %c0_723 = arith.constant 0 : index
    %385 = vector.load %arg5[%c0_722, %c0_723] : memref<96x64xf32, #tpu.memory_space<vmem>>, vector<96x64xf32>
    %cst = arith.constant dense<0.000000e+00> : vector<8x64xf32>
    %386 = tpu.matmul %384, %385, %cst {dimension_numbers = #tpu.dot_dimension_numbers<[1], [0], [0], [1], [0, 0, 1, 1], [], []>} : vector<8x96xf32>, vector<96x64xf32>, vector<8x64xf32> -> vector<8x64xf32>
    %c0_724 = arith.constant 0 : index
    %c0_725 = arith.constant 0 : index
    %387 = vector.load %arg3[%c0_724, %c0_725] : memref<8x1xf32, #tpu.memory_space<vmem>>, vector<8x1xf32>
    %388 = vector.broadcast %387 : vector<8x1xf32> to vector<8x64xf32>
    %389 = arith.addf %386, %388 : vector<8x64xf32>
    %cst_726 = arith.constant 0.000000e+00 : f32
    %390 = vector.broadcast %cst_726 : f32 to vector<8x64xf32>
    %391 = arith.cmpf ogt, %389, %390 : vector<8x64xf32>
    %cst_727 = arith.constant 1.000000e-01 : f32
    %392 = vector.broadcast %cst_727 : f32 to vector<8x64xf32>
    %393 = arith.mulf %389, %392 : vector<8x64xf32>
    %394 = arith.select %391, %389, %393 : vector<8x64xi1>, vector<8x64xf32>
    %395 = vector.extract_strided_slice %394 {offsets = [0, 0], sizes = [6, 64], strides = [1, 1]} : vector<8x64xf32> to vector<6x64xf32>
    %c0_728 = arith.constant 0 : index
    %c0_729 = arith.constant 0 : index
    %c0_730 = arith.constant 0 : index
    %396 = vector.load %arg4[%c0_728, %c0_729, %c0_730] : memref<1x6x64xf32, #tpu.memory_space<vmem>>, vector<1x6x64xf32>
    %397 = vector.shape_cast %396 : vector<1x6x64xf32> to vector<6x64xf32>
    %398 = vector.shape_cast %395 : vector<6x64xf32> to vector<1x6x64xf32>
    tpu.vector_store %arg4[%c0_728, %c0_729, %c0_730], %398 {strides = array<i32>} : memref<1x6x64xf32, #tpu.memory_space<vmem>>, vector<1x6x64xf32>,
    return
  }
  func.func @transform_0(%arg0: i32) -> (i32, i32, i32, i32) {
    %c0_i32 = arith.constant 0 : i32
    %c0_i32_0 = arith.constant 0 : i32
    %c0_i32_1 = arith.constant 0 : i32
    %c0_i32_2 = arith.constant 0 : i32
    return %arg0, %c0_i32, %c0_i32_0, %c0_i32_1 : i32, i32, i32, i32
  }
  func.func @transform_1(%arg0: i32) -> (i32, i32) {
    %c0_i32 = arith.constant 0 : i32
    %c0_i32_0 = arith.constant 0 : i32
    %c0_i32_1 = arith.constant 0 : i32
    return %c0_i32, %c0_i32_0 : i32, i32
  }
  func.func @transform_2(%arg0: i32) -> (i32, i32) {
    %c0_i32 = arith.constant 0 : i32
    %c0_i32_0 = arith.constant 0 : i32
    %c0_i32_1 = arith.constant 0 : i32
    return %c0_i32, %c0_i32_0 : i32, i32
  }
  func.func @transform_3(%arg0: i32) -> (i32, i32, i32) {
    %c0_i32 = arith.constant 0 : i32
    %c0_i32_0 = arith.constant 0 : i32
    %c0_i32_1 = arith.constant 0 : i32
    return %arg0, %c0_i32, %c0_i32_0 : i32, i32, i32
  }
}

</mosaic_0001>

<bundles_post_ra>
// kernel: conv2d_leaky.1
= control target key start
LH: loop header
LB: loop body
LE: loop exit
PB: predicated region body
PF: predicated region fallthrough
CT: control target
= control target key end

     0   :  { %s1369_s12 = smov 0   ;;  %s1780_s0 = inlined_call_operand.vmem [shape: f32[2,36,6,9], index: 0, kind: input, shape index: {}]   ;;  %s1781_s1 = inlined_call_operand.vmem [shape: f32[8,96], index: 1, kind: input, shape index: {}]   ;;  %s1782_s2 = inlined_call_operand.vmem [shape: f32[8,1], index: 2, kind: input, shape index: {}]   ;;  %s1783_s3 = inlined_call_operand.vmem [shape: f32[2,6,64], index: 3, kind: output, shape index: {}]  }
   0x1 LB: > { %s1099_s13 = sadd.s32 4294967295, %s1328_s12   ;;  %p1103_p0 = scmp.ge.s32.totalorder %s1328_s12, 1  ;;  %s1328_s12 = sphi %s1369_s12, %s13_s12  }
   0x2   : > { %p137_p1 = scmp.lt.s32.totalorder %s1328_s12, 3 }
   0x4   : > { %p138_p2 = pnand %p1103_p0, %p137_p1 }
   0x5   : > { %p160_p3 = scmp.lt.s32.totalorder (!%p138_p2), %s1099_s13, 1  ;;  %s1330_s18 = smov (!%p138_p2), 8   ;;  %vm170_vm0 = vcmask (!%p138_p2), 62464   ;;  %v1344_v36 = vmov (!%p138_p2), 0.0|0.0   ;;  %vm246_vm1 = vcmask (!%p138_p2), 128064   ;;  %vm347_vm2 = vcmask (!%p138_p2), 193664  }
   0x6   : > { %141 = sbr.rel (%p138_p2) target bundleno = 601 (0x259), region = 32  ;;  %s1331_s19 = smov (!%p138_p2), 127   ;;  %1275 = vmatprep.subr.bf16.mxu0 (!%p138_p2), %v1344_v36  ;;  %vm448_vm3 = vcmask (!%p138_p2), 259264   ;;  %vm549_vm4 = vcmask (!%p138_p2), 324864   ;;  %vm650_vm5 = vcmask (!%p138_p2), 390464   ;;  %vm751_vm6 = vcmask (!%p138_p2), 456064  }
   0x7   : > { %s1332_s20 = smov (!%p138_p2), 7   ;;  %s1333_s21 = smov (!%p138_p2), 16   ;;  %vm852_vm7 = vcmask (!%p138_p2), 521664   ;;  %vm1346_vm8 = vmmov (!%p138_p2), 0   ;;  %vm967_vm9 = vcmask (!%p138_p2), 785408   ;;  %vm1044_vm11 = vcmask (!%p138_p2), 521216  }
   0x8   : > { %s1334_s22 = smov (!%p138_p2), 24   ;;  %s1335_s23 = smov (!%p138_p2), 15  }
   0x9   : > { %s1336_s24 = smov (!%p138_p2), 23   ;;  %s1337_s25 = smov (!%p138_p2), 32  }
   0xa   : > { %s1338_s26 = smov (!%p138_p2), 31   ;;  %s1339_s27 = smov (!%p138_p2), 40  }
   0xb   : > { %s1340_s28 = smov (!%p138_p2), 39   ;;  %s1341_s29 = smov (!%p138_p2), 48  }
   0xc   : > { %s1342_s30 = smov (!%p138_p2), 47   ;;  %s1343_s4 = smov (!%p138_p2), 56  }
   0xd   : > { %s1785_s13 = smov (!%p160_p3, %s1099_s13), 1  ;;  %s1345_s5 = smov 55  }
   0xe   : > { %s1293_s14 = smul.u32 288, %s1785_s13  ;;  %s1105_s10 = sshll.u32 %s1785_s13, 3 }
   0xf   : > { %s168_s15 = scalar_lea.vmem %s1783_s3, %s1105_s10 }
  0x10   : > { %s1383_s17 = scalar_lea.vmem %s1780_s0, %s1293_s14 }
  0x11   : > { %v1121_v0 = vld [vmem:[%s1383_s17 + $0xa0] sm:$0x3f]  ;;  %v1122_v2 = vld [vmem:[%s1383_s17 + $0x10] sm:$0x3f]  ;;  %v1124_v16 = vld [vmem:[%s1383_s17 + $0x18] sm:$0x3f] }
  0x12   : > { %v175_v1 = vld [vmem:[%s1383_s17] sm:$0x3f]  ;;  %250 = vrot.lane.b32.xlu1 %v1121_v0, %s1330_s18  ;;  %v1120_v3 = vld [vmem:[%s1383_s17 + $0x10] sm:$0x3f]  ;;  %v1108_v18 = vld [vmem:[%s1383_s17 + $0x8] sm:$0x3f] }
  0x13   : > { %177 = vrot.lane.b32.xlu0 %v175_v1, %s1331_s19  ;;  %v1137_v4 = vld [vmem:[%s1383_s17 + $0xb0] sm:$0x3f]  ;;  %v1136_v5 = vld [vmem:[%s1383_s17 + $0x20] sm:$0x3f]  ;;  %189 = vst.msk [vmem:[#allocation2 + $0x18] sm:$0x3f] %vm170_vm0, %v1108_v18 }
  0x14   : > { %v1152_v6 = vld [vmem:[%s1383_s17 + $0x30] sm:$0x3f]  ;;  %v1138_v7 = vld [vmem:[%s1383_s17 + $0x20] sm:$0x3f]  ;;  %v1109_v19 = vld [vmem:[%s1383_s17 + $0x98] sm:$0x3f] }
  0x15   : > { %v1154_v8 = vld [vmem:[%s1383_s17 + $0x30] sm:$0x3f]  ;;  %v1153_v9 = vld [vmem:[%s1383_s17 + $0xc0] sm:$0x3f]  ;;  %192 = vst.msk [vmem:[#allocation2 + $0x1e] sm:$0x3f] %vm170_vm0, %v1109_v19 }
  0x16   : > { %256 = vrot.lane.b32.xlu1 %v1122_v2, %s1332_s20  ;;  %v1168_v10 = vld [vmem:[%s1383_s17 + $0x40] sm:$0x3f]  ;;  %v1107_v11 = vld [vmem:[%s1383_s17 + $0x90] sm:$0x3f]  ;;  %v1125_v21 = vld [vmem:[%s1383_s17 + $0xa8] sm:$0x3f] }
  0x17   : > { %243 = vrot.lane.b32.xlu0 %v1120_v3, %s1330_s18  ;;  %v1106_v12 = vld [vmem:[%s1383_s17 + $0x90] sm:$0x3f]  ;;  %v1170_v13 = vld [vmem:[%s1383_s17 + $0x40] sm:$0x3f]  ;;  %v1140_v24 = vld [vmem:[%s1383_s17 + $0x28] sm:$0x3f] }
  0x18   : > { %v1169_v14 = vld [vmem:[%s1383_s17 + $0xd0] sm:$0x3f]  ;;  %174 = vst.msk [vmem:[#allocation2 + $0x6] sm:$0x3f] %vm170_vm0, %v1106_v12  ;;  %v169_v15 = vld [vmem:[%s1383_s17] sm:$0x3f] }
  0x19   : > { %171 = vst.msk [vmem:[#allocation2] sm:$0x3f] %vm170_vm0, %v169_v15  ;;  %v1123_v17 = vld [vmem:[%s1383_s17 + $0xa0] sm:$0x3f]  ;;  %v1184_v20 = vld [vmem:[%s1383_s17 + $0x50] sm:$0x3f] }
  0x1a   : > { %351 = vrot.lane.b32.xlu1 %v1137_v4, %s1333_s21  ;;  %v1186_v22 = vld [vmem:[%s1383_s17 + $0x50] sm:$0x3f]  ;;  %v1185_v23 = vld [vmem:[%s1383_s17 + $0xe0] sm:$0x3f]  ;;  %v1141_v27 = vld [vmem:[%s1383_s17 + $0xb8] sm:$0x3f] }
  0x1b   : > { %344 = vrot.lane.b32.xlu0 %v1136_v5, %s1333_s21  ;;  %v1139_v25 = vld [vmem:[%s1383_s17 + $0xb0] sm:$0x3f]  ;;  %v1200_v26 = vld [vmem:[%s1383_s17 + $0x60] sm:$0x3f]  ;;  %v1156_v30 = vld [vmem:[%s1383_s17 + $0x38] sm:$0x3f] }
  0x1c   : > { %v1202_v28 = vld [vmem:[%s1383_s17 + $0x60] sm:$0x3f]  ;;  %v1201_v29 = vld [vmem:[%s1383_s17 + $0xf0] sm:$0x3f]  ;;  %v1157_v33 = vld [vmem:[%s1383_s17 + $0xc8] sm:$0x3f] }
  0x1d   : > { %v1155_v31 = vld [vmem:[%s1383_s17 + $0xc0] sm:$0x3f]  ;;  %v1216_v32 = vld [vmem:[%s1383_s17 + $0x70] sm:$0x3f]  ;;  %v1111_v37 = vld [vmem:[%s1383_s17 + $0x98] sm:$0x3f] }
  0x1e   : > { %445 = vrot.lane.b32.xlu1 %v1152_v6, %s1334_s22  ;;  %v1218_v34 = vld [vmem:[%s1383_s17 + $0x70] sm:$0x3f]  ;;  %v1217_v35 = vld [vmem:[%s1383_s17 + $0x100] sm:$0x3f]  ;;  %v1110_v38 = vld [vmem:[%s1383_s17 + $0x8] sm:$0x3f] }
  0x1f   : > { %357 = vrot.lane.b32.xlu0 %v1138_v7, %s1335_s23  ;;  %v1172_v39 = vld [vmem:[%s1383_s17 + $0x48] sm:$0x3f]  ;;  %v1171_v40 = vld [vmem:[%s1383_s17 + $0xd0] sm:$0x3f]  ;;  %v1126_v41 = vld [vmem:[%s1383_s17 + $0x18] sm:$0x3f] }
  0x20   : > { %v1173_v42 = vld [vmem:[%s1383_s17 + $0xd8] sm:$0x3f]  ;;  %v1187_v43 = vld [vmem:[%s1383_s17 + $0xe0] sm:$0x3f]  ;;  %v1127_v44 = vld [vmem:[%s1383_s17 + $0xa8] sm:$0x3f] }
  0x21   : > { %v1189_v45 = vld [vmem:[%s1383_s17 + $0xe8] sm:$0x3f]  ;;  %v1188_v46 = vld [vmem:[%s1383_s17 + $0x58] sm:$0x3f]  ;;  %v1203_v50 = vld [vmem:[%s1383_s17 + $0xf0] sm:$0x3f] }
  0x22   : > { %458 = vrot.lane.b32.xlu1 %v1154_v8, %s1336_s24  ;;  %v1143_v47 = vld [vmem:[%s1383_s17 + $0xb8] sm:$0x3f]  ;;  %v1142_v48 = vld [vmem:[%s1383_s17 + $0x28] sm:$0x3f]  ;;  %v1112_v53 = vld [vmem:[%s1383_s17 + $0x10] sm:$0x3f] }
  0x23   : > { %452 = vrot.lane.b32.xlu0 %v1153_v9, %s1334_s22  ;;  %v1204_v49 = vld [vmem:[%s1383_s17 + $0x68] sm:$0x3f]  ;;  %v1158_v51 = vld [vmem:[%s1383_s17 + $0x38] sm:$0x3f]  ;;  %v1219_v54 = vld [vmem:[%s1383_s17 + $0x100] sm:$0x3f] }
  0x24   : > { %v1205_v52 = vld [vmem:[%s1383_s17 + $0xf8] sm:$0x3f]  ;;  %v1159_v55 = vld [vmem:[%s1383_s17 + $0xc8] sm:$0x3f]  ;;  %207 = vst.msk [vmem:[#allocation2 + $0x30] sm:$0x3f] %vm170_vm0, %v1112_v53 }
  0x25   : > { %v1221_v56 = vld [vmem:[%s1383_s17 + $0x108] sm:$0x3f]  ;;  %v1220_v57 = vld [vmem:[%s1383_s17 + $0x78] sm:$0x3f]  ;;  %v1113_v58 = vld [vmem:[%s1383_s17 + $0xa0] sm:$0x3f] }
  0x26   : > { %546 = vrot.lane.b32.xlu1 %v1168_v10, %s1337_s25  ;;  %210 = vst.msk [vmem:[#allocation2 + $0x36] sm:$0x3f] %vm170_vm0, %v1113_v58  ;;  %v1174_v59 = vld [vmem:[%s1383_s17 + $0x48] sm:$0x3f]  ;;  %v1114_v60 = vld [vmem:[%s1383_s17 + $0x10] sm:$0x3f] }
  0x27   : > { %183 = vrot.lane.b32.xlu0 %v1107_v11, %s1331_s19  ;;  %v1128_v61 = vld [vmem:[%s1383_s17 + $0x20] sm:$0x3f]  ;;  %v1175_v62 = vld [vmem:[%s1383_s17 + $0xd8] sm:$0x3f]  ;;  %v1129_v0 = vld [vmem:[%s1383_s17 + $0xb0] sm:$0x3f] }
  0x28   : > { %v1130_v63 = vld [vmem:[%s1383_s17 + $0x20] sm:$0x3f]  ;;  %v1191_v1 = vld [vmem:[%s1383_s17 + $0xe8] sm:$0x3f]  ;;  %v1190_v2 = vld [vmem:[%s1383_s17 + $0x58] sm:$0x3f] }
  0x29   : > { %v1145_v5 = vld [vmem:[%s1383_s17 + $0xc0] sm:$0x3f]  ;;  %v1144_v6 = vld [vmem:[%s1383_s17 + $0x30] sm:$0x3f]  ;;  %v1206_v9 = vld [vmem:[%s1383_s17 + $0x68] sm:$0x3f] }
  0x2a   : > { %559 = vrot.lane.b32.xlu1 %v1170_v13, %s1338_s26  ;;  %v1146_v10 = vld [vmem:[%s1383_s17 + $0x30] sm:$0x3f]  ;;  %v1160_v13 = vld [vmem:[%s1383_s17 + $0x40] sm:$0x3f]  ;;  %v1149_v53 = vld [vmem:[%s1383_s17 + $0xc8] sm:$0x3f] }
  0x2b   : > { %553 = vrot.lane.b32.xlu0 %v1169_v14, %s1337_s25  ;;  %v1207_v14 = vld [vmem:[%s1383_s17 + $0xf8] sm:$0x3f]  ;;  %v1161_v18 = vld [vmem:[%s1383_s17 + $0xd0] sm:$0x3f] }
  0x2e   : > { %268 = vrot.lane.b32.xlu1 %v1124_v16, %s1330_s18 }
  0x2f   : > { %262 = vrot.lane.b32.xlu0 %v1123_v17, %s1332_s20  ;;  %v1162_v17 = vld [vmem:[%s1383_s17 + $0x40] sm:$0x3f] }
  0x32   : > { %647 = vrot.lane.b32.xlu1 %v1184_v20, %s1339_s27 }
  0x33   : > { %274 = vrot.lane.b32.xlu0 %v1125_v21, %s1330_s18  ;;  %v1223_v21 = vld [vmem:[%s1383_s17 + $0x108] sm:$0x3f] }
  0x36   : > { %660 = vrot.lane.b32.xlu1 %v1186_v22, %s1340_s28  ;;  %v1222_v22 = vld [vmem:[%s1383_s17 + $0x78] sm:$0x3f] }
  0x37   : > { %654 = vrot.lane.b32.xlu0 %v1185_v23, %s1339_s27  ;;  %v1116_v23 = vld [vmem:[%s1383_s17 + $0x18] sm:$0x3f] }
  0x38   : > { %225 = vst.msk [vmem:[#allocation2 + $0x48] sm:$0x3f] %vm170_vm0, %v1116_v23  ;;  %v1195_v23 = vld [vmem:[%s1383_s17 + $0xf0] sm:$0x3f] }
  0x3a   : > { %369 = vrot.lane.b32.xlu1 %v1140_v24, %s1333_s21 }
  0x3b   : > { %363 = vrot.lane.b32.xlu0 %v1139_v25, %s1335_s23 }
  0x3e   : > { %748 = vrot.lane.b32.xlu1 %v1200_v26, %s1341_s29  ;;  %v1176_v26 = vld [vmem:[%s1383_s17 + $0x50] sm:$0x3f] }
  0x3f   : > { %375 = vrot.lane.b32.xlu0 %v1141_v27, %s1333_s21  ;;  %v1115_v27 = vld [vmem:[%s1383_s17 + $0xa0] sm:$0x3f] }
  0x42   : > { %761 = vrot.lane.b32.xlu1 %v1202_v28, %s1342_s30  ;;  %v1117_v28 = vld [vmem:[%s1383_s17 + $0xa8] sm:$0x3f] }
  0x43   : > { %755 = vrot.lane.b32.xlu0 %v1201_v29, %s1341_s29  ;;  %228 = vst.msk [vmem:[#allocation2 + $0x4e] sm:$0x3f] %vm170_vm0, %v1117_v28  ;;  %v1196_v28 = vld [vmem:[%s1383_s17 + $0x68] sm:$0x3f] }
  0x46   : > { %470 = vrot.lane.b32.xlu1 %v1156_v30, %s1334_s22 }
  0x47   : > { %464 = vrot.lane.b32.xlu0 %v1155_v31, %s1336_s24  ;;  %v1178_v31 = vld [vmem:[%s1383_s17 + $0x50] sm:$0x3f] }
  0x4a   : > { %849 = vrot.lane.b32.xlu1 %v1216_v32, %s1343_s4  ;;  %v1177_v32 = vld [vmem:[%s1383_s17 + $0xe0] sm:$0x3f] }
  0x4b   : > { %476 = vrot.lane.b32.xlu0 %v1157_v33, %s1334_s22 }
  0x4e   : > { %862 = vrot.lane.b32.xlu1 %v1218_v34, %s1345_s5 }
  0x4f   : > { %856 = vrot.lane.b32.xlu0 %v1217_v35, %s1343_s4  ;;  %v1132_v35 = vld [vmem:[%s1383_s17 + $0x28] sm:$0x3f] }
  0x52   : > { %201 = vrot.lane.b32.xlu1 %v1111_v37, %s1331_s19  ;;  %v1131_v37 = vld [vmem:[%s1383_s17 + $0xb0] sm:$0x3f] }
  0x53   : > { %195 = vrot.lane.b32.xlu0 %v1110_v38, %s1331_s19 }
  0x56   : > { %571 = vrot.lane.b32.xlu1 %v1172_v39, %s1337_s25 }
  0x57   : > { %565 = vrot.lane.b32.xlu0 %v1171_v40, %s1338_s26  ;;  %v1192_v40 = vld [vmem:[%s1383_s17 + $0x60] sm:$0x3f] }
  0x5a   : > { %280 = vrot.lane.b32.xlu1 %v1126_v41, %s1332_s20  ;;  %v1133_v41 = vld [vmem:[%s1383_s17 + $0xb8] sm:$0x3f] }
  0x5b   : > { %577 = vrot.lane.b32.xlu0 %v1173_v42, %s1337_s25 }
  0x5e   : > { %666 = vrot.lane.b32.xlu1 %v1187_v43, %s1340_s28 }
  0x5f   : > { %286 = vrot.lane.b32.xlu0 %v1127_v44, %s1332_s20  ;;  %v1194_v44 = vld [vmem:[%s1383_s17 + $0x60] sm:$0x3f] }
  0x62   : > { %678 = vrot.lane.b32.xlu1 %v1189_v45, %s1339_s27  ;;  %v1193_v45 = vld [vmem:[%s1383_s17 + $0xf0] sm:$0x3f] }
  0x63   : > { %672 = vrot.lane.b32.xlu0 %v1188_v46, %s1339_s27 }
  0x66   : > { %387 = vrot.lane.b32.xlu1 %v1143_v47, %s1335_s23 }
  0x67   : > { %381 = vrot.lane.b32.xlu0 %v1142_v48, %s1335_s23  ;;  %v1148_v48 = vld [vmem:[%s1383_s17 + $0x38] sm:$0x3f] }
  0x6a   : > { %773 = vrot.lane.b32.xlu1 %v1204_v49, %s1341_s29  ;;  %v1147_v49 = vld [vmem:[%s1383_s17 + $0xc0] sm:$0x3f] }
  0x6b   : > { %767 = vrot.lane.b32.xlu0 %v1203_v50, %s1342_s30 }
  0x6e   : > { %482 = vrot.lane.b32.xlu1 %v1158_v51, %s1336_s24 }
  0x6f   : > { %779 = vrot.lane.b32.xlu0 %v1205_v52, %s1341_s29  ;;  %v1208_v52 = vld [vmem:[%s1383_s17 + $0x70] sm:$0x3f] }
  0x72   : > { %868 = vrot.lane.b32.xlu1 %v1219_v54, %s1345_s5 }
  0x73   : > { %488 = vrot.lane.b32.xlu0 %v1159_v55, %s1336_s24 }
  0x76   : > { %880 = vrot.lane.b32.xlu1 %v1221_v56, %s1343_s4  ;;  %v1210_v56 = vld [vmem:[%s1383_s17 + $0x70] sm:$0x3f] }
  0x77   : > { %874 = vrot.lane.b32.xlu0 %v1220_v57, %s1343_s4  ;;  %v1209_v57 = vld [vmem:[%s1383_s17 + $0x100] sm:$0x3f] }
  0x7a   : > { %583 = vrot.lane.b32.xlu1 %v1174_v59, %s1338_s26 }
  0x7b   : > { %213 = vrot.lane.b32.xlu0 %v1114_v60, %s1331_s19  ;;  %v1164_v60 = vld [vmem:[%s1383_s17 + $0x48] sm:$0x3f] }
  0x7e   : > { %293 = vrot.lane.b32.xlu1 %v1128_v61, %s1330_s18  ;;  %v1163_v61 = vld [vmem:[%s1383_s17 + $0xd0] sm:$0x3f] }
  0x7f   : > { %589 = vrot.lane.b32.xlu0 %v1175_v62, %s1338_s26 }
  0x82   : > { %306 = vrot.lane.b32.xlu1 %v1130_v63, %s1332_s20 }
  0x83   : > { %300 = vrot.lane.b32.xlu0 %v1129_v0, %s1330_s18  ;;  %v1224_v0 = vld [vmem:[%s1383_s17 + $0x80] sm:$0x3f] }
  0x84   : > { %v251_v3 = vpop.permute.xlu1 %250 }
  0x85   : > { %v178_v4 = vpop.permute.xlu0 %177  ;;  %253 = vst.msk [vmem:[#allocation2 + $0x6] sm:$0x3f] %vm246_vm1, %v251_v3 }
  0x86   : > { %180 = vst.msk [vmem:[#allocation2 + $0xc] sm:$0x3f] %vm170_vm0, %v178_v4  ;;  %690 = vrot.lane.b32.xlu1 %v1191_v1, %s1340_s28  ;;  %v1165_v1 = vld [vmem:[%s1383_s17 + $0xd8] sm:$0x3f]  ;;  %v1226_v4 = vld [vmem:[%s1383_s17 + $0x80] sm:$0x3f] }
  0x87   : > { %684 = vrot.lane.b32.xlu0 %v1190_v2, %s1340_s28 }
  0x88   : > { %v257_v7 = vpop.permute.xlu1 %256 }
  0x89   : > { %v244_v8 = vpop.permute.xlu0 %243  ;;  %259 = vst.msk [vmem:[#allocation2 + $0xc] sm:$0x3f] %vm246_vm1, %v257_v7 }
  0x8a   : > { %247 = vst.msk [vmem:[#allocation2] sm:$0x3f] %vm246_vm1, %v244_v8  ;;  %401 = vrot.lane.b32.xlu1 %v1145_v5, %s1333_s21  ;;  %v1225_v5 = vld [vmem:[%s1383_s17 + $0x110] sm:$0x3f]  ;;  %v1119_v8 = vld [vmem:[%s1383_s17 + $0xa8] sm:$0x3f] }
  0x8b   : > { %394 = vrot.lane.b32.xlu0 %v1144_v6, %s1333_s21 }
  0x8c   : > { %v352_v11 = vpop.permute.xlu1 %351 }
  0x8d   : > { %v345_v12 = vpop.permute.xlu0 %344  ;;  %354 = vst.msk [vmem:[#allocation2 + $0x6] sm:$0x3f] %vm347_vm2, %v352_v11 }
  0x8e   : > { %348 = vst.msk [vmem:[#allocation2] sm:$0x3f] %vm347_vm2, %v345_v12  ;;  %785 = vrot.lane.b32.xlu1 %v1206_v9, %s1342_s30  ;;  %v1118_v9 = vld [vmem:[%s1383_s17 + $0x18] sm:$0x3f] }
  0x8f   : > { %407 = vrot.lane.b32.xlu0 %v1146_v10, %s1335_s23 }
  0x90   : > { %v446_v15 = vpop.permute.xlu1 %445 }
  0x91   : > { %v358_v16 = vpop.permute.xlu0 %357  ;;  %449 = vst.msk [vmem:[#allocation2] sm:$0x3f] %vm448_vm3, %v446_v15  ;;  %v1180_v15 = vld [vmem:[%s1383_s17 + $0x58] sm:$0x3f] }
  0x92   : > { %360 = vst.msk [vmem:[#allocation2 + $0xc] sm:$0x3f] %vm347_vm2, %v358_v16  ;;  %495 = vrot.lane.b32.xlu1 %v1160_v13, %s1334_s22  ;;  %v1179_v16 = vld [vmem:[%s1383_s17 + $0xe0] sm:$0x3f] }
  0x93   : > { %791 = vrot.lane.b32.xlu0 %v1207_v14, %s1342_s30 }
  0x94   : > { %v459_v19 = vpop.permute.xlu1 %458 }
  0x95   : > { %v453_v20 = vpop.permute.xlu0 %452  ;;  %461 = vst.msk [vmem:[#allocation2 + $0xc] sm:$0x3f] %vm448_vm3, %v459_v19  ;;  %v1134_v19 = vld [vmem:[%s1383_s17 + $0x28] sm:$0x3f] }
  0x96   : > { %455 = vst.msk [vmem:[#allocation2 + $0x6] sm:$0x3f] %vm448_vm3, %v453_v20  ;;  %508 = vrot.lane.b32.xlu1 %v1162_v17, %s1336_s24  ;;  %v1181_v20 = vld [vmem:[%s1383_s17 + $0xe8] sm:$0x3f] }
  0x97   : > { %502 = vrot.lane.b32.xlu0 %v1161_v18, %s1334_s22 }
  0x98   : > { %v547_v24 = vpop.permute.xlu1 %546 }
  0x99   : > { %v184_v25 = vpop.permute.xlu0 %183  ;;  %550 = vst.msk [vmem:[#allocation2] sm:$0x3f] %vm549_vm4, %v547_v24  ;;  %v1135_v24 = vld [vmem:[%s1383_s17 + $0xb8] sm:$0x3f] }
  0x9a   : > { %186 = vst.msk [vmem:[#allocation2 + $0x12] sm:$0x3f] %vm170_vm0, %v184_v25  ;;  %892 = vrot.lane.b32.xlu1 %v1223_v21, %s1345_s5 }
  0x9b   : > { %886 = vrot.lane.b32.xlu0 %v1222_v22, %s1345_s5 }
  0x9c   : > { %v560_v29 = vpop.permute.xlu1 %559 }
  0x9d   : > { %v554_v30 = vpop.permute.xlu0 %553  ;;  %562 = vst.msk [vmem:[#allocation2 + $0xc] sm:$0x3f] %vm549_vm4, %v560_v29 }
  0x9e   : > { %556 = vst.msk [vmem:[#allocation2 + $0x6] sm:$0x3f] %vm549_vm4, %v554_v30  ;;  %596 = vrot.lane.b32.xlu1 %v1176_v26, %s1337_s25 }
  0x9f   : > { %219 = vrot.lane.b32.xlu0 %v1115_v27, %s1331_s19  ;;  %v1197_v27 = vld [vmem:[%s1383_s17 + $0xf8] sm:$0x3f] }
  0xa0   : > { %v269_v33 = vpop.permute.xlu1 %268 }
  0xa1   : > { %v263_v34 = vpop.permute.xlu0 %262  ;;  %271 = vst.msk [vmem:[#allocation2 + $0x18] sm:$0x3f] %vm246_vm1, %v269_v33 }
  0xa2   : > { %265 = vst.msk [vmem:[#allocation2 + $0x12] sm:$0x3f] %vm246_vm1, %v263_v34  ;;  %609 = vrot.lane.b32.xlu1 %v1178_v31, %s1338_s26  ;;  %v1151_v31 = vld [vmem:[%s1383_s17 + $0xc8] sm:$0x3f] }
  0xa3   : > { %603 = vrot.lane.b32.xlu0 %v1177_v32, %s1337_s25  ;;  %v1150_v32 = vld [vmem:[%s1383_s17 + $0x38] sm:$0x3f] }
  0xa4   : > { %v648_v38 = vpop.permute.xlu1 %647 }
  0xa5   : > { %v275_v39 = vpop.permute.xlu0 %274  ;;  %651 = vst.msk [vmem:[#allocation2] sm:$0x3f] %vm650_vm5, %v648_v38 }
  0xa6   : > { %277 = vst.msk [vmem:[#allocation2 + $0x1e] sm:$0x3f] %vm246_vm1, %v275_v39  ;;  %319 = vrot.lane.b32.xlu1 %v1132_v35, %s1330_s18  ;;  %v1212_v35 = vld [vmem:[%s1383_s17 + $0x78] sm:$0x3f] }
  0xa7   : > { %312 = vrot.lane.b32.xlu0 %v1131_v37, %s1332_s20  ;;  %v1211_v37 = vld [vmem:[%s1383_s17 + $0x100] sm:$0x3f] }
  0xa8   : > { %v661_v42 = vpop.permute.xlu1 %660 }
  0xa9   : > { %v655_v43 = vpop.permute.xlu0 %654  ;;  %663 = vst.msk [vmem:[#allocation2 + $0xc] sm:$0x3f] %vm650_vm5, %v661_v42 }
  0xaa   : > { %657 = vst.msk [vmem:[#allocation2 + $0x6] sm:$0x3f] %vm650_vm5, %v655_v43  ;;  %697 = vrot.lane.b32.xlu1 %v1192_v40, %s1339_s27  ;;  %v1166_v40 = vld [vmem:[%s1383_s17 + $0x48] sm:$0x3f] }
  0xab   : > { %326 = vrot.lane.b32.xlu0 %v1133_v41, %s1330_s18  ;;  %v1213_v41 = vld [vmem:[%s1383_s17 + $0x108] sm:$0x3f] }
  0xac   : > { %v370_v46 = vpop.permute.xlu1 %369 }
  0xad   : > { %v364_v47 = vpop.permute.xlu0 %363  ;;  %372 = vst.msk [vmem:[#allocation2 + $0x18] sm:$0x3f] %vm347_vm2, %v370_v46 }
  0xae   : > { %366 = vst.msk [vmem:[#allocation2 + $0x12] sm:$0x3f] %vm347_vm2, %v364_v47  ;;  %710 = vrot.lane.b32.xlu1 %v1194_v44, %s1340_s28  ;;  %v1227_v44 = vld [vmem:[%s1383_s17 + $0x110] sm:$0x3f] }
  0xaf   : > { %704 = vrot.lane.b32.xlu0 %v1193_v45, %s1339_s27  ;;  %v1167_v45 = vld [vmem:[%s1383_s17 + $0xd8] sm:$0x3f] }
  0xb0   : > { %v749_v50 = vpop.permute.xlu1 %748 }
  0xb1   : > { %v376_v51 = vpop.permute.xlu0 %375  ;;  %752 = vst.msk [vmem:[#allocation2] sm:$0x3f] %vm751_vm6, %v749_v50 }
  0xb2   : > { %378 = vst.msk [vmem:[#allocation2 + $0x1e] sm:$0x3f] %vm347_vm2, %v376_v51  ;;  %420 = vrot.lane.b32.xlu1 %v1148_v48, %s1333_s21  ;;  %v1229_v48 = vld [vmem:[%s1383_s17 + $0x118] sm:$0x3f] }
  0xb3   : > { %413 = vrot.lane.b32.xlu0 %v1147_v49, %s1335_s23  ;;  %v1228_v49 = vld [vmem:[%s1383_s17 + $0x88] sm:$0x3f] }
  0xb4   : > { %v762_v54 = vpop.permute.xlu1 %761 }
  0xb5   : > { %v756_v55 = vpop.permute.xlu0 %755  ;;  %764 = vst.msk [vmem:[#allocation2 + $0xc] sm:$0x3f] %vm751_vm6, %v762_v54 }
  0xb6   : > { %758 = vst.msk [vmem:[#allocation2 + $0x6] sm:$0x3f] %vm751_vm6, %v756_v55  ;;  %798 = vrot.lane.b32.xlu1 %v1208_v52, %s1341_s29  ;;  %v1183_v52 = vld [vmem:[%s1383_s17 + $0xe8] sm:$0x3f] }
  0xb7   : > { %427 = vrot.lane.b32.xlu0 %v1149_v53, %s1333_s21  ;;  %v1182_v53 = vld [vmem:[%s1383_s17 + $0x58] sm:$0x3f] }
  0xb8   : > { %v471_v58 = vpop.permute.xlu1 %470 }
  0xb9   : > { %v465_v59 = vpop.permute.xlu0 %464  ;;  %473 = vst.msk [vmem:[#allocation2 + $0x18] sm:$0x3f] %vm448_vm3, %v471_v58 }
  0xba   : > { %467 = vst.msk [vmem:[#allocation2 + $0x12] sm:$0x3f] %vm448_vm3, %v465_v59  ;;  %811 = vrot.lane.b32.xlu1 %v1210_v56, %s1342_s30  ;;  %v1199_v59 = vld [vmem:[%s1383_s17 + $0xf8] sm:$0x3f] }
  0xbb   : > { %805 = vrot.lane.b32.xlu0 %v1209_v57, %s1341_s29 }
  0xbc   : > { %v850_v62 = vpop.permute.xlu1 %849 }
  0xbd   : > { %v477_v63 = vpop.permute.xlu0 %476  ;;  %853 = vst.msk [vmem:[#allocation2] sm:$0x3f] %vm852_vm7, %v850_v62 }
  0xbe   : > { %479 = vst.msk [vmem:[#allocation2 + $0x1e] sm:$0x3f] %vm448_vm3, %v477_v63  ;;  %521 = vrot.lane.b32.xlu1 %v1164_v60, %s1334_s22  ;;  %v1198_v60 = vld [vmem:[%s1383_s17 + $0x68] sm:$0x3f] }
  0xbf   : > { %514 = vrot.lane.b32.xlu0 %v1163_v61, %s1336_s24  ;;  %v1215_v63 = vld [vmem:[%s1383_s17 + $0x108] sm:$0x3f] }
  0xc0   : > { %v863_v2 = vpop.permute.xlu1 %862 }
  0xc1   : > { %v857_v3 = vpop.permute.xlu0 %856  ;;  %865 = vst.msk [vmem:[#allocation2 + $0xc] sm:$0x3f] %vm852_vm7, %v863_v2 }
  0xc2   : > { %859 = vst.msk [vmem:[#allocation2 + $0x6] sm:$0x3f] %vm852_vm7, %v857_v3  ;;  %899 = vrot.lane.b32.xlu1 %v1224_v0, %s1343_s4  ;;  %v1214_v0 = vld [vmem:[%s1383_s17 + $0x78] sm:$0x3f] }
  0xc3   : > { %528 = vrot.lane.b32.xlu0 %v1165_v1, %s1334_s22  ;;  %v1231_v3 = vld [vmem:[%s1383_s17 + $0x118] sm:$0x3f] }
  0xc4   : > { %v202_v6 = vpop.permute.xlu1 %201 }
  0xc5   : > { %v196_v7 = vpop.permute.xlu0 %195  ;;  %204 = vst.msk [vmem:[#allocation2 + $0x2a] sm:$0x3f] %vm170_vm0, %v202_v6 }
  0xc6   : > { %198 = vst.msk [vmem:[#allocation2 + $0x24] sm:$0x3f] %vm170_vm0, %v196_v7  ;;  %912 = vrot.lane.b32.xlu1 %v1226_v4, %s1345_s5  ;;  %v1230_v4 = vld [vmem:[%s1383_s17 + $0x88] sm:$0x3f]  ;;  %v1347_v7 = vmov 0.0  }
  0xc7   : > { %906 = vrot.lane.b32.xlu0 %v1225_v5, %s1343_s4  ;;  %1272 = vmatprep.mubr.msk.f32.mxu0 %vm1346_vm8, %v1347_v7 }
  0xc8   : > { %v572_v10 = vpop.permute.xlu1 %571 }
  0xc9   : > { %v566_v11 = vpop.permute.xlu0 %565  ;;  %v949_v12 = vld [vmem:[#allocation2] sm:$0xff]  ;;  %v950_v13 = vld [vmem:[#allocation2 + $0x8] sm:$0xff]  ;;  %574 = vst.msk [vmem:[#allocation2 + $0x18] sm:$0x3f] %vm549_vm4, %v572_v10 }
  0xca   : > { %568 = vst.msk [vmem:[#allocation2 + $0x12] sm:$0x3f] %vm549_vm4, %v566_v11  ;;  %v1276_v14 = vpack.c.bf16 %v950_v13, %v949_v12  ;;  %237 = vrot.lane.b32.xlu1 %v1119_v8, %s1331_s19  ;;  %v1348_v8 = vmov 0  }
  0xcb   : > { %231 = vrot.lane.b32.xlu0 %v1118_v9, %s1331_s19  ;;  %v961_v9 = vld [vmem:[%s1782_s2] sm:$0xff] }
  0xcc   : > { %1277 = vmatpush3.bf16.msra.mxu0 %v1276_v14  ;;  %v281_v17 = vpop.permute.xlu1 %280  ;;  %1321 = vset.pattern.permute.xlu0 %v1348_v8 }
  0xcd   : > { %v578_v18 = vpop.permute.xlu0 %577  ;;  %1278 = vmatprep.subr.bf16.mxu0 %v1344_v36  ;;  %283 = vst.msk [vmem:[#allocation2 + $0x24] sm:$0x3f] %vm246_vm1, %v281_v17 }
  0xce   : > { %580 = vst.msk [vmem:[#allocation2 + $0x1e] sm:$0x3f] %vm549_vm4, %v578_v18  ;;  %622 = vrot.lane.b32.xlu1 %v1180_v15, %s1337_s25 }
  0xcf   : > { %615 = vrot.lane.b32.xlu0 %v1179_v16, %s1338_s26 }
  0xd0   : > { %v667_v21 = vpop.permute.xlu1 %666 }
  0xd1   : > { %v287_v22 = vpop.permute.xlu0 %286  ;;  %669 = vst.msk [vmem:[#allocation2 + $0x12] sm:$0x3f] %vm650_vm5, %v667_v21 }
  0xd2   : > { %289 = vst.msk [vmem:[#allocation2 + $0x2a] sm:$0x3f] %vm246_vm1, %v287_v22  ;;  %332 = vrot.lane.b32.xlu1 %v1134_v19, %s1332_s20 }
  0xd3   : > { %629 = vrot.lane.b32.xlu0 %v1181_v20, %s1337_s25 }
  0xd4   : > { %v679_v25 = vpop.permute.xlu1 %678 }
  0xd5   : > { %v673_v26 = vpop.permute.xlu0 %672  ;;  %681 = vst.msk [vmem:[#allocation2 + $0x1e] sm:$0x3f] %vm650_vm5, %v679_v25 }
  0xd6   : > { %675 = vst.msk [vmem:[#allocation2 + $0x18] sm:$0x3f] %vm650_vm5, %v673_v26  ;;  %716 = vrot.lane.b32.xlu1 %v1195_v23, %s1340_s28 }
  0xd7   : > { %338 = vrot.lane.b32.xlu0 %v1135_v24, %s1332_s20 }
  0xd8   : > { %v388_v29 = vpop.permute.xlu1 %387 }
  0xd9   : > { %v382_v30 = vpop.permute.xlu0 %381  ;;  %390 = vst.msk [vmem:[#allocation2 + $0x2a] sm:$0x3f] %vm347_vm2, %v388_v29 }
  0xda   : > { %384 = vst.msk [vmem:[#allocation2 + $0x24] sm:$0x3f] %vm347_vm2, %v382_v30  ;;  %730 = vrot.lane.b32.xlu1 %v1197_v27, %s1339_s27 }
  0xdb   : > { %723 = vrot.lane.b32.xlu0 %v1196_v28, %s1339_s27 }
  0xdc   : > { %v774_v33 = vpop.permute.xlu1 %773 }
  0xdd   : > { %v768_v34 = vpop.permute.xlu0 %767  ;;  %776 = vst.msk [vmem:[#allocation2 + $0x18] sm:$0x3f] %vm751_vm6, %v774_v33 }
  0xde   : > { %770 = vst.msk [vmem:[#allocation2 + $0x12] sm:$0x3f] %vm751_vm6, %v768_v34  ;;  %439 = vrot.lane.b32.xlu1 %v1151_v31, %s1335_s23 }
  0xdf   : > { %433 = vrot.lane.b32.xlu0 %v1150_v32, %s1335_s23 }
  0xe0   : > { %v483_v38 = vpop.permute.xlu1 %482 }
  0xe1   : > { %v780_v39 = vpop.permute.xlu0 %779  ;;  %485 = vst.msk [vmem:[#allocation2 + $0x24] sm:$0x3f] %vm448_vm3, %v483_v38 }
  0xe2   : > { %782 = vst.msk [vmem:[#allocation2 + $0x1e] sm:$0x3f] %vm751_vm6, %v780_v39  ;;  %824 = vrot.lane.b32.xlu1 %v1212_v35, %s1341_s29 }
  0xe3   : > { %817 = vrot.lane.b32.xlu0 %v1211_v37, %s1342_s30 }
  0xe4   : > { %v869_v42 = vpop.permute.xlu1 %868 }
  0xe5   : > { %v489_v43 = vpop.permute.xlu0 %488  ;;  %871 = vst.msk [vmem:[#allocation2 + $0x12] sm:$0x3f] %vm852_vm7, %v869_v42 }
  0xe6   : > { %491 = vst.msk [vmem:[#allocation2 + $0x2a] sm:$0x3f] %vm448_vm3, %v489_v43  ;;  %534 = vrot.lane.b32.xlu1 %v1166_v40, %s1336_s24 }
  0xe7   : > { %831 = vrot.lane.b32.xlu0 %v1213_v41, %s1341_s29 }
  0xe8   : > { %v881_v46 = vpop.permute.xlu1 %880 }
  0xe9   : > { %v875_v47 = vpop.permute.xlu0 %874  ;;  %883 = vst.msk [vmem:[#allocation2 + $0x1e] sm:$0x3f] %vm852_vm7, %v881_v46 }
  0xea   : > { %877 = vst.msk [vmem:[#allocation2 + $0x18] sm:$0x3f] %vm852_vm7, %v875_v47  ;;  %918 = vrot.lane.b32.xlu1 %v1227_v44, %s1345_s5 }
  0xeb   : > { %540 = vrot.lane.b32.xlu0 %v1167_v45, %s1336_s24 }
  0xec   : > { %v584_v50 = vpop.permute.xlu1 %583  ;;  %v951_v56 = vld [vmem:[#allocation2 + $0x10] sm:$0xff] }
  0xed   : > { %v214_v51 = vpop.permute.xlu0 %213  ;;  %586 = vst.msk [vmem:[#allocation2 + $0x24] sm:$0x3f] %vm549_vm4, %v584_v50 }
  0xee   : > { %216 = vst.msk [vmem:[#allocation2 + $0x3c] sm:$0x3f] %vm170_vm0, %v214_v51  ;;  %932 = vrot.lane.b32.xlu1 %v1229_v48, %s1343_s4 }
  0xef   : > { %925 = vrot.lane.b32.xlu0 %v1228_v49, %s1343_s4 }
  0xf0   : > { %v294_v54 = vpop.permute.xlu1 %293 }
  0xf1   : > { %v590_v55 = vpop.permute.xlu0 %589  ;;  %v952_v57 = vld [vmem:[#allocation2 + $0x18] sm:$0xff]  ;;  %296 = vst.msk [vmem:[#allocation2 + $0x30] sm:$0x3f] %vm246_vm1, %v294_v54 }
  0xf2   : > { %592 = vst.msk [vmem:[#allocation2 + $0x2a] sm:$0x3f] %vm549_vm4, %v590_v55  ;;  %v1279_v58 = vpack.c.bf16 %v952_v57, %v951_v56  ;;  %641 = vrot.lane.b32.xlu1 %v1183_v52, %s1338_s26 }
  0xf3   : > { %635 = vrot.lane.b32.xlu0 %v1182_v53, %s1338_s26 }
  0xf4   : > { %1280 = vmatpush3.bf16.msra.mxu0 %v1279_v58  ;;  %v307_v61 = vpop.permute.xlu1 %306 }
  0xf5   : > { %v301_v62 = vpop.permute.xlu0 %300  ;;  %1281 = vmatprep.subr.bf16.mxu0 %v1344_v36  ;;  %309 = vst.msk [vmem:[#allocation2 + $0x3c] sm:$0x3f] %vm246_vm1, %v307_v61 }
  0xf6   : > { %303 = vst.msk [vmem:[#allocation2 + $0x36] sm:$0x3f] %vm246_vm1, %v301_v62  ;;  %742 = vrot.lane.b32.xlu1 %v1199_v59, %s1340_s28 }
  0xf7   : > { %736 = vrot.lane.b32.xlu0 %v1198_v60, %s1340_s28 }
  0xf8   : > { %v691_v1 = vpop.permute.xlu1 %690 }
  0xf9   : > { %v685_v2 = vpop.permute.xlu0 %684  ;;  %693 = vst.msk [vmem:[#allocation2 + $0x2a] sm:$0x3f] %vm650_vm5, %v691_v1 }
  0xfa   : > { %687 = vst.msk [vmem:[#allocation2 + $0x24] sm:$0x3f] %vm650_vm5, %v685_v2  ;;  %843 = vrot.lane.b32.xlu1 %v1215_v63, %s1342_s30 }
  0xfb   : > { %837 = vrot.lane.b32.xlu0 %v1214_v0, %s1342_s30 }
  0xfc   : > { %v402_v5 = vpop.permute.xlu1 %401 }
  0xfd   : > { %v395_v6 = vpop.permute.xlu0 %394  ;;  %404 = vst.msk [vmem:[#allocation2 + $0x36] sm:$0x3f] %vm347_vm2, %v402_v5 }
  0xfe   : > { %397 = vst.msk [vmem:[#allocation2 + $0x30] sm:$0x3f] %vm347_vm2, %v395_v6  ;;  %944 = vrot.lane.b32.xlu1 %v1231_v3, %s1345_s5 }
  0xff   : > { %938 = vrot.lane.b32.xlu0 %v1230_v4, %s1345_s5 }
 0x100   : > { %v786_v10 = vpop.permute.xlu1 %785 }
 0x101   : > { %v408_v11 = vpop.permute.xlu0 %407  ;;  %788 = vst.msk [vmem:[#allocation2 + $0x24] sm:$0x3f] %vm751_vm6, %v786_v10 }
 0x102   : > { %410 = vst.msk [vmem:[#allocation2 + $0x3c] sm:$0x3f] %vm347_vm2, %v408_v11 }
 0x103   : > { %964 = vperm.xlu0 %1321, %v961_v9  }
 0x104   : > { %v496_v12 = vpop.permute.xlu1 %495 }
 0x105   : > { %v792_v13 = vpop.permute.xlu0 %791  ;;  %498 = vst.msk [vmem:[#allocation2 + $0x30] sm:$0x3f] %vm448_vm3, %v496_v12 }
 0x106   : > { %794 = vst.msk [vmem:[#allocation2 + $0x2a] sm:$0x3f] %vm751_vm6, %v792_v13 }
 0x108   : > { %v509_v14 = vpop.permute.xlu1 %508 }
 0x109   : > { %v503_v15 = vpop.permute.xlu0 %502  ;;  %511 = vst.msk [vmem:[#allocation2 + $0x3c] sm:$0x3f] %vm448_vm3, %v509_v14 }
 0x10a   : > { %505 = vst.msk [vmem:[#allocation2 + $0x36] sm:$0x3f] %vm448_vm3, %v503_v15 }
 0x10c   : > { %v893_v16 = vpop.permute.xlu1 %892 }
 0x10d   : > { %v887_v17 = vpop.permute.xlu0 %886  ;;  %895 = vst.msk [vmem:[#allocation2 + $0x2a] sm:$0x3f] %vm852_vm7, %v893_v16 }
 0x10e   : > { %889 = vst.msk [vmem:[#allocation2 + $0x24] sm:$0x3f] %vm852_vm7, %v887_v17  ;;  %v948_v17 = vld [vmem:[%s1781_s1] sm:$0xff] }
 0x110   : > { %v597_v18 = vpop.permute.xlu1 %596 }
 0x111   : > { %v220_v19 = vpop.permute.xlu0 %219  ;;  %599 = vst.msk [vmem:[#allocation2 + $0x30] sm:$0x3f] %vm549_vm4, %v597_v18 }
 0x112   : > { %222 = vst.msk [vmem:[#allocation2 + $0x42] sm:$0x3f] %vm170_vm0, %v220_v19 }
 0x114   : > { %v610_v20 = vpop.permute.xlu1 %609 }
 0x115   : > { %v604_v21 = vpop.permute.xlu0 %603  ;;  %v953_v22 = vld [vmem:[#allocation2 + $0x20] sm:$0xff]  ;;  %v954_v23 = vld [vmem:[#allocation2 + $0x28] sm:$0xff]  ;;  %612 = vst.msk [vmem:[#allocation2 + $0x3c] sm:$0x3f] %vm549_vm4, %v610_v20 }
 0x116   : > { %606 = vst.msk [vmem:[#allocation2 + $0x36] sm:$0x3f] %vm549_vm4, %v604_v21  ;;  %v1282_v24 = vpack.c.bf16 %v954_v23, %v953_v22 }
 0x118   : > { %1283 = vmatpush3.bf16.msra.mxu0 %v1282_v24  ;;  %v320_v25 = vpop.permute.xlu1 %319 }
 0x119   : > { %v313_v26 = vpop.permute.xlu0 %312  ;;  %1284 = vmatprep.subr.bf16.mxu0 %v1344_v36  ;;  %322 = vst.msk [vmem:[#allocation2 + $0x48] sm:$0x3f] %vm246_vm1, %v320_v25 }
 0x11a   : > { %315 = vst.msk [vmem:[#allocation2 + $0x42] sm:$0x3f] %vm246_vm1, %v313_v26 }
 0x11c   : > { %v698_v27 = vpop.permute.xlu1 %697 }
 0x11d   : > { %v327_v28 = vpop.permute.xlu0 %326  ;;  %700 = vst.msk [vmem:[#allocation2 + $0x30] sm:$0x3f] %vm650_vm5, %v698_v27 }
 0x11e   : > { %329 = vst.msk [vmem:[#allocation2 + $0x4e] sm:$0x3f] %vm246_vm1, %v327_v28 }
 0x120   : > { %v711_v29 = vpop.permute.xlu1 %710 }
 0x121   : > { %v705_v30 = vpop.permute.xlu0 %704  ;;  %713 = vst.msk [vmem:[#allocation2 + $0x3c] sm:$0x3f] %vm650_vm5, %v711_v29 }
 0x122   : > { %707 = vst.msk [vmem:[#allocation2 + $0x36] sm:$0x3f] %vm650_vm5, %v705_v30 }
 0x124   : > { %v421_v31 = vpop.permute.xlu1 %420 }
 0x125   : > { %v414_v32 = vpop.permute.xlu0 %413  ;;  %423 = vst.msk [vmem:[#allocation2 + $0x48] sm:$0x3f] %vm347_vm2, %v421_v31 }
 0x126   : > { %416 = vst.msk [vmem:[#allocation2 + $0x42] sm:$0x3f] %vm347_vm2, %v414_v32 }
 0x128   : > { %v799_v33 = vpop.permute.xlu1 %798 }
 0x129   : > { %v428_v34 = vpop.permute.xlu0 %427  ;;  %801 = vst.msk [vmem:[#allocation2 + $0x30] sm:$0x3f] %vm751_vm6, %v799_v33 }
 0x12a   : > { %430 = vst.msk [vmem:[#allocation2 + $0x4e] sm:$0x3f] %vm347_vm2, %v428_v34 }
 0x12c   : > { %v812_v35 = vpop.permute.xlu1 %811 }
 0x12d   : > { %v806_v37 = vpop.permute.xlu0 %805  ;;  %814 = vst.msk [vmem:[#allocation2 + $0x3c] sm:$0x3f] %vm751_vm6, %v812_v35 }
 0x12e   : > { %808 = vst.msk [vmem:[#allocation2 + $0x36] sm:$0x3f] %vm751_vm6, %v806_v37 }
 0x130   : > { %v522_v38 = vpop.permute.xlu1 %521 }
 0x131   : > { %v515_v39 = vpop.permute.xlu0 %514  ;;  %524 = vst.msk [vmem:[#allocation2 + $0x48] sm:$0x3f] %vm448_vm3, %v522_v38 }
 0x132   : > { %517 = vst.msk [vmem:[#allocation2 + $0x42] sm:$0x3f] %vm448_vm3, %v515_v39 }
 0x134   : > { %v900_v40 = vpop.permute.xlu1 %899 }
 0x135   : > { %v529_v41 = vpop.permute.xlu0 %528  ;;  %902 = vst.msk [vmem:[#allocation2 + $0x30] sm:$0x3f] %vm852_vm7, %v900_v40 }
 0x136   : > { %531 = vst.msk [vmem:[#allocation2 + $0x4e] sm:$0x3f] %vm448_vm3, %v529_v41 }
 0x138   : > { %v913_v42 = vpop.permute.xlu1 %912 }
 0x139   : > { %v907_v43 = vpop.permute.xlu0 %906  ;;  %915 = vst.msk [vmem:[#allocation2 + $0x3c] sm:$0x3f] %vm852_vm7, %v913_v42 }
 0x13a   : > { %909 = vst.msk [vmem:[#allocation2 + $0x36] sm:$0x3f] %vm852_vm7, %v907_v43 }
 0x13c   : > { %v238_v44 = vpop.permute.xlu1 %237 }
 0x13d   : > { %v232_v45 = vpop.permute.xlu0 %231  ;;  %240 = vst.msk [vmem:[#allocation2 + $0x5a] sm:$0x3f] %vm170_vm0, %v238_v44 }
 0x13e   : > { %234 = vst.msk [vmem:[#allocation2 + $0x54] sm:$0x3f] %vm170_vm0, %v232_v45 }
 0x140   : > { %v623_v46 = vpop.permute.xlu1 %622 }
 0x141   : > { %v616_v47 = vpop.permute.xlu0 %615  ;;  %v955_v48 = vld [vmem:[#allocation2 + $0x30] sm:$0xff]  ;;  %v956_v49 = vld [vmem:[#allocation2 + $0x38] sm:$0xff]  ;;  %625 = vst.msk [vmem:[#allocation2 + $0x48] sm:$0x3f] %vm549_vm4, %v623_v46 }
 0x142   : > { %618 = vst.msk [vmem:[#allocation2 + $0x42] sm:$0x3f] %vm549_vm4, %v616_v47  ;;  %v1285_v50 = vpack.c.bf16 %v956_v49, %v955_v48 }
 0x144   : > { %1286 = vmatpush3.bf16.msra.mxu0 %v1285_v50  ;;  %v333_v51 = vpop.permute.xlu1 %332 }
 0x145   : > { %v630_v52 = vpop.permute.xlu0 %629  ;;  %1287 = vmatprep.subr.bf16.mxu0 %v1344_v36  ;;  %335 = vst.msk [vmem:[#allocation2 + $0x54] sm:$0x3f] %vm246_vm1, %v333_v51 }
 0x146   : > { %632 = vst.msk [vmem:[#allocation2 + $0x4e] sm:$0x3f] %vm549_vm4, %v630_v52 }
 0x148   : > { %v717_v53 = vpop.permute.xlu1 %716 }
 0x149   : > { %v339_v54 = vpop.permute.xlu0 %338  ;;  %719 = vst.msk [vmem:[#allocation2 + $0x42] sm:$0x3f] %vm650_vm5, %v717_v53 }
 0x14a   : > { %341 = vst.msk [vmem:[#allocation2 + $0x5a] sm:$0x3f] %vm246_vm1, %v339_v54 }
 0x14c   : > { %v731_v55 = vpop.permute.xlu1 %730 }
 0x14d   : > { %v724_v56 = vpop.permute.xlu0 %723  ;;  %733 = vst.msk [vmem:[#allocation2 + $0x4e] sm:$0x3f] %vm650_vm5, %v731_v55 }
 0x14e   : > { %726 = vst.msk [vmem:[#allocation2 + $0x48] sm:$0x3f] %vm650_vm5, %v724_v56 }
 0x150   : > { %v440_v57 = vpop.permute.xlu1 %439 }
 0x151   : > { %v434_v58 = vpop.permute.xlu0 %433  ;;  %442 = vst.msk [vmem:[#allocation2 + $0x5a] sm:$0x3f] %vm347_vm2, %v440_v57 }
 0x152   : > { %436 = vst.msk [vmem:[#allocation2 + $0x54] sm:$0x3f] %vm347_vm2, %v434_v58 }
 0x154   : > { %v825_v59 = vpop.permute.xlu1 %824 }
 0x155   : > { %v818_v60 = vpop.permute.xlu0 %817  ;;  %827 = vst.msk [vmem:[#allocation2 + $0x48] sm:$0x3f] %vm751_vm6, %v825_v59 }
 0x156   : > { %820 = vst.msk [vmem:[#allocation2 + $0x42] sm:$0x3f] %vm751_vm6, %v818_v60 }
 0x158   : > { %v535_v61 = vpop.permute.xlu1 %534 }
 0x159   : > { %v832_v62 = vpop.permute.xlu0 %831  ;;  %537 = vst.msk [vmem:[#allocation2 + $0x54] sm:$0x3f] %vm448_vm3, %v535_v61 }
 0x15a   : > { %834 = vst.msk [vmem:[#allocation2 + $0x4e] sm:$0x3f] %vm751_vm6, %v832_v62 }
 0x15c   : > { %v919_v63 = vpop.permute.xlu1 %918 }
 0x15d   : > { %v541_v0 = vpop.permute.xlu0 %540  ;;  %921 = vst.msk [vmem:[#allocation2 + $0x42] sm:$0x3f] %vm852_vm7, %v919_v63 }
 0x15e   : > { %543 = vst.msk [vmem:[#allocation2 + $0x5a] sm:$0x3f] %vm448_vm3, %v541_v0 }
 0x160   : > { %v933_v1 = vpop.permute.xlu1 %932 }
 0x161   : > { %v926_v2 = vpop.permute.xlu0 %925  ;;  %935 = vst.msk [vmem:[#allocation2 + $0x4e] sm:$0x3f] %vm852_vm7, %v933_v1 }
 0x162   : > { %928 = vst.msk [vmem:[#allocation2 + $0x48] sm:$0x3f] %vm852_vm7, %v926_v2 }
 0x164   : > { %v642_v3 = vpop.permute.xlu1 %641  ;;  %v957_v7 = vld [vmem:[#allocation2 + $0x40] sm:$0xff] }
 0x165   : > { %v636_v4 = vpop.permute.xlu0 %635  ;;  %644 = vst.msk [vmem:[#allocation2 + $0x5a] sm:$0x3f] %vm549_vm4, %v642_v3 }
 0x166   : > { %638 = vst.msk [vmem:[#allocation2 + $0x54] sm:$0x3f] %vm549_vm4, %v636_v4 }
 0x168   : > { %v743_v5 = vpop.permute.xlu1 %742 }
 0x169   : > { %v737_v6 = vpop.permute.xlu0 %736  ;;  %v958_v8 = vld [vmem:[#allocation2 + $0x48] sm:$0xff]  ;;  %745 = vst.msk [vmem:[#allocation2 + $0x5a] sm:$0x3f] %vm650_vm5, %v743_v5 }
 0x16a   : > { %739 = vst.msk [vmem:[#allocation2 + $0x54] sm:$0x3f] %vm650_vm5, %v737_v6  ;;  %v1288_v9 = vpack.c.bf16 %v958_v8, %v957_v7 }
 0x16c   : > { %1289 = vmatpush3.bf16.msra.mxu0 %v1288_v9  ;;  %v844_v10 = vpop.permute.xlu1 %843 }
 0x16d   : > { %v838_v11 = vpop.permute.xlu0 %837  ;;  %1290 = vmatprep.subr.bf16.mxu0 %v1344_v36  ;;  %846 = vst.msk [vmem:[#allocation2 + $0x5a] sm:$0x3f] %vm751_vm6, %v844_v10 }
 0x16e   : > { %840 = vst.msk [vmem:[#allocation2 + $0x54] sm:$0x3f] %vm751_vm6, %v838_v11 }
 0x170   : > { %v945_v12 = vpop.permute.xlu1 %944 }
 0x171   : > { %v939_v13 = vpop.permute.xlu0 %938  ;;  %947 = vst.msk [vmem:[#allocation2 + $0x5a] sm:$0x3f] %vm852_vm7, %v945_v12 }
 0x172   : > { %941 = vst.msk [vmem:[#allocation2 + $0x54] sm:$0x3f] %vm852_vm7, %v939_v13 }
 0x179   : > { %v959_v14 = vld [vmem:[#allocation2 + $0x50] sm:$0xff]  ;;  %v960_v15 = vld [vmem:[#allocation2 + $0x58] sm:$0xff] }
 0x17a   : > { %v1291_v16 = vpack.c.bf16 %v960_v15, %v959_v14 }
 0x17c   : > { %1292 = vmatpush3.bf16.msra.mxu0 %v1291_v16 }
 0x17f   : > { %1273 = vmatmul.mubr.msk.f32.vlgmr.msra.gmra.mrb[0].mxu0 %vm967_vm9, %v948_v17 }
 0x182   : > { %v965_v36 = vpop.permute.xlu0 %964 }
 0x252   : > { %v1037_v18 = vpop.f32.mrb[0].mxu0 }
 0x253   : > { %v1038_v19 = vadd.f32 %v1037_v18, %v965_v36  ;;  %v1274_v20 = vpop.f32.mrb[1].mxu0 }
 0x255   : > { %vm1041_vm10 = vcmp.gt.f32.partialorder %v1038_v19, 0.0  ;;  %v1042_v21 = vmul.f32 0.1, %v1038_v19 }
 0x257   : > { %v1043_v22 = vsel %vm1041_vm10, %v1038_v19, %v1042_v21 }
 0x258   : > { %1045 = vst.msk [vmem:[%s168_s15] sm:$0x3f] %vm1044_vm11, %v1043_v22 }
 0x259 PF: > { %s13_s12 = sadd.s32 1, %s1328_s12  }
 0x25a   : > { %p10_p4 = scmp.ge.s32.totalorder %s13_s12, 4  }
 0x25c   :  { %12 = sbr.rel (!%p10_p4) target bundleno = 1 (0x1), region = 97 }

</bundles_post_ra>
